<compile_context>
chip_gen: v7x
topology: tpu7x:2x2x1
jax: 0.10.0
libtpu: 0.0.40
codegen_flags: <defaults>
</compile_context>

<pallas_src>
import jax
import jax.numpy as jnp
from jax.experimental import pallas as pl
from jax.experimental.pallas import tpu as pltpu


def _bilinear_up2_coeffs(L):
    """PyTorch Upsample(scale=2, mode='bilinear', align_corners=False) coeffs."""
    out = jnp.arange(2 * L, dtype=jnp.float32)
    src = jnp.maximum((out + 0.5) / 2.0 - 0.5, 0.0)
    i0 = jnp.minimum(jnp.floor(src), L - 1).astype(jnp.int32)
    frac = src - i0.astype(jnp.float32)
    i1 = jnp.minimum(i0 + 1, L - 1)
    return i0, i1, frac


def _up_matrix_1d(L):
    """Dense (2L, L) operator for the 1-D bilinear x2 upsample."""
    i0, i1, frac = _bilinear_up2_coeffs(L)
    rows = jnp.arange(2 * L)
    m = jnp.zeros((2 * L, L), jnp.float32)
    m = m.at[rows, i0].add(1.0 - frac)
    m = m.at[rows, i1].add(frac)
    return m


def upblock_pallas(x, res, params):
    B, C_half, H, W = x.shape
    _, C_res, H2, W2 = res.shape
    assert H2 == 2 * H and W2 == 2 * W
    C_in = C_half + C_res
    F = params["b1"].shape[0]
    N, N2 = H * W, H2 * W2
    PAD = 128                       # lane padding of staging buffer (>= W2+1, aligned)
    assert PAD >= W2 + 1
    C_rows = max(C_in, F)
    COL_ROWS = 9 * C_rows

    # ---------- host-side folded operators / repacked weights (tiny) ----------
    u_t = jnp.kron(_up_matrix_1d(H), _up_matrix_1d(W)).T            # (N, N2) upsample op
    q = jnp.arange(N)
    p_even = 2 * (q // W) * W2 + 2 * (q % W)
    s_t = jnp.zeros((N, N2), jnp.float32).at[q, p_even].set(1.0)    # (N, N2) even-pixel scatter

    hh = jnp.arange(H2)[:, None]
    ww = jnp.arange(W2)[None, :]
    mask_list = []
    for ky in range(3):
        for kx in range(3):
            dy, dx = ky - 1, kx - 1
            valid = ((hh + dy >= 0) & (hh + dy < H2)
                     & (ww + dx >= 0) & (ww + dx < W2))
            mask_list.append(valid.reshape(-1))
    masks = jnp.stack(mask_list, 0).astype(jnp.float32)             # (9, N2) tap validity

    w1_flat = params["w1"].transpose(0, 2, 3, 1).reshape(F, 9 * C_in)
    w2_flat = params["w2"].transpose(0, 2, 3, 1).reshape(F, 9 * F)
    wr_t = params["wr"].T                                           # (F, C_half)
    bias_all = jnp.stack([params["b1"], params["b2"], params["br"]], axis=1)  # (F, 3)

    x_flat = x.reshape(B, C_half, N)
    res_flat = res.reshape(B, C_res, N2)

    def kernel(x_ref, res_ref, ut_ref, st_ref, wr_ref, w1_ref, w2_ref,
               bias_ref, mask_ref, o_ref, col_ref, pad_ref):
        xb = x_ref[...].astype(jnp.float32)                         # (C_half, N)
        m_all = mask_ref[...]                                       # (9, N2)

        # bilinear x2 upsample: single MXU matmul, contraction depth N
        up = jnp.dot(xb, ut_ref[...], preferred_element_type=jnp.float32)   # (C_half, N2)

        # cat([up, res], channel axis) into the zero lane-padded staging buffer
        pad_ref[...] = jnp.zeros_like(pad_ref)
        cat = jnp.concatenate([up, res_ref[...].astype(jnp.float32)], axis=0)  # (C_in, N2)
        pad_ref[pl.ds(0, C_in), pl.ds(PAD, N2)] = cat

        def conv3x3(rows, w_flat, bias_col):
            # im2col: 9 shifted+masked copies of the feature map, then one deep matmul
            for t in range(9):
                dy, dx = t // 3 - 1, t % 3 - 1
                s = dy * W2 + dx
                col_ref[pl.ds(t * rows, rows), :] = (
                    pad_ref[pl.ds(0, rows), pl.ds(PAD + s, N2)] * m_all[t:t + 1, :])
            h = jnp.dot(w_flat, col_ref[pl.ds(0, 9 * rows), :],
                        preferred_element_type=jnp.float32)
            h = h + bias_ref[:, bias_col:bias_col + 1]
            return jnp.where(h >= 0, h, 0.2 * h)                    # LeakyReLU(0.2)

        h1 = conv3x3(C_in, w1_ref[...], 0)                          # (F, N2)
        pad_ref[pl.ds(0, F), pl.ds(PAD, N2)] = h1
        h2 = conv3x3(F, w2_ref[...], 1)                             # (F, N2)

        # stride-2 1x1 ConvTranspose: project, then scatter to even pixels via MXU
        y = jnp.dot(wr_ref[...], xb, preferred_element_type=jnp.float32)     # (F, N)
        cres = jnp.dot(y, st_ref[...], preferred_element_type=jnp.float32)   # (F, N2)
        cres = cres + bias_ref[:, 2:3]

        o_ref[...] = (h2 + cres).astype(o_ref.dtype)                # lane-dense (F, 256) store

    out = pl.pallas_call(
        kernel,
        out_shape=jax.ShapeDtypeStruct((B, F, N2), x.dtype),
        grid_spec=pltpu.PrefetchScalarGridSpec(
            num_scalar_prefetch=0,
            grid=(B,),
            in_specs=[
                pl.BlockSpec((pl.Squeezed(), C_half, N), lambda b: (b, 0, 0)),   # x
                pl.BlockSpec((pl.Squeezed(), C_res, N2), lambda b: (b, 0, 0)),   # res
                pl.BlockSpec((N, N2), lambda b: (0, 0)),         # U^T  (upsample operator)
                pl.BlockSpec((N, N2), lambda b: (0, 0)),         # S^T  (even-pixel scatter)
                pl.BlockSpec((F, C_half), lambda b: (0, 0)),     # conv_res weight^T
                pl.BlockSpec((F, 9 * C_in), lambda b: (0, 0)),   # conv1 weight (im2col layout)
                pl.BlockSpec((F, 9 * F), lambda b: (0, 0)),      # conv2 weight (im2col layout)
                pl.BlockSpec((F, 3), lambda b: (0, 0)),          # [b1 | b2 | br]
                pl.BlockSpec((9, N2), lambda b: (0, 0)),         # tap validity masks
            ],
            out_specs=pl.BlockSpec((pl.Squeezed(), F, N2), lambda b: (b, 0, 0)),
            scratch_shapes=[
                pltpu.VMEM((COL_ROWS, N2), jnp.float32),          # im2col columns
                pltpu.VMEM((C_rows, N2 + 2 * PAD), jnp.float32),  # lane-padded staging map
            ],
        ),
        compiler_params=pltpu.CompilerParams(
            dimension_semantics=("parallel",)),
    )(x_flat, res_flat, u_t, s_t, wr_t, w1_flat, w2_flat, bias_all, masks)

    return out.reshape(B, F, H2, W2)


def upblock_reference(x, res, p):
    """Pure-JAX mirror of the PyTorch UpBlock forward for verification."""
    hp = jax.lax.Precision.HIGHEST
    B, C_half, H, W = x.shape
    F = p["b1"].shape[0]

    i0, i1, fh = _bilinear_up2_coeffs(H)
    tmp = (x[:, :, i0, :] * (1.0 - fh)[None, None, :, None]
           + x[:, :, i1, :] * fh[None, None, :, None])
    j0, j1, fw = _bilinear_up2_coeffs(W)
    up = (tmp[:, :, :, j0] * (1.0 - fw)[None, None, None, :]
          + tmp[:, :, :, j1] * fw[None, None, None, :])

    cat = jnp.concatenate([up, res], axis=1)

    def conv3x3(a, w, b):
        o = jax.lax.conv_general_dilated(
            a, w, (1, 1), "SAME",
            dimension_numbers=("NCHW", "OIHW", "NCHW"), precision=hp)
        return o + b[None, :, None, None]

    lrelu = lambda a: jnp.where(a >= 0, a, 0.2 * a)
    h1 = lrelu(conv3x3(cat, p["w1"], p["b1"]))
    h2 = lrelu(conv3x3(h1, p["w2"], p["b2"]))

    # ConvTranspose2d(C_half, F, 1, stride=2) with output_size=(2H, 2W)
    y = jnp.einsum("bchw,cf->bfhw", x, p["wr"], precision=hp)
    cres = jnp.zeros((B, F, 2 * H, 2 * W), jnp.float32).at[:, :, ::2, ::2].set(y)
    cres = cres + p["br"][None, :, None, None]
    return h2 + cres


if __name__ == "__main__":
    key = jax.random.PRNGKey(0)
    B, input_channels, filters, H, W = 2, 8, 8, 8, 8
    C_half = input_channels // 2
    C_res = input_channels - C_half

    ks = jax.random.split(key, 8)
    x = jax.random.normal(ks[0], (B, C_half, H, W), jnp.float32)
    res = jax.random.normal(ks[1], (B, C_res, 2 * H, 2 * W), jnp.float32)
    params = {
        # ConvTranspose2d(C_half, filters, 1, stride=2): weight (in, out, 1, 1) squeezed
        "wr": jax.random.normal(ks[2], (C_half, filters), jnp.float32) * 0.2,
        "br": jax.random.normal(ks[3], (filters,), jnp.float32) * 0.1,
        # double_conv: Conv2d(C_in, F, 3, pad=1) / Conv2d(F, F, 3, pad=1), LeakyReLU(0.2)
        "w1": jax.random.normal(ks[4], (filters, input_channels, 3, 3), jnp.float32) * 0.1,
        "b1": jax.random.normal(ks[5], (filters,), jnp.float32) * 0.1,
        "w2": jax.random.normal(ks[6], (filters, filters, 3, 3), jnp.float32) * 0.1,
        "b2": jax.random.normal(ks[7], (filters,), jnp.float32) * 0.1,
    }

    out = upblock_pallas(x, res, params)
    jax.block_until_ready(out)

    ref = upblock_reference(x, res, params)
    err = float(jnp.max(jnp.abs(out - ref)))
    assert out.shape == (B, filters, 2 * H, 2 * W)
    assert jnp.allclose(out, ref, atol=2e-3, rtol=2e-3), f"mismatch, max abs err = {err}"
    print("KERNEL_OK")
</pallas_src>

<mosaic_0001>
module attributes {stable_mosaic.version = 11 : i64} {
  func.func @kernel(%arg0: i32, %arg1: memref<1x4x64xf32, #tpu.memory_space<vmem>>, %arg2: memref<1x4x256xf32, #tpu.memory_space<vmem>>, %arg3: memref<64x256xf32, #tpu.memory_space<vmem>>, %arg4: memref<64x256xf32, #tpu.memory_space<vmem>>, %arg5: memref<8x4xf32, #tpu.memory_space<vmem>>, %arg6: memref<8x72xf32, #tpu.memory_space<vmem>>, %arg7: memref<8x72xf32, #tpu.memory_space<vmem>>, %arg8: memref<8x3xf32, #tpu.memory_space<vmem>>, %arg9: memref<9x256xf32, #tpu.memory_space<vmem>>, %arg10: memref<1x8x256xf32, #tpu.memory_space<vmem>>, %arg11: memref<72x256xf32, #tpu.memory_space<vmem>>, %arg12: memref<8x512xf32, #tpu.memory_space<vmem>>) attributes {dimension_semantics = [#tpu.dimension_semantics<parallel>], iteration_bounds = array<i64: 2>, scalar_prefetch = 0 : i64, scratch_operands = 2 : i64, tpu.core_type = #tpu.core_type<tc>, window_params = [{transform_indices = @transform_0, window_bounds = array<i64: 1, 4, 64>}, {transform_indices = @transform_1, window_bounds = array<i64: 1, 4, 256>}, {pipeline_mode = #tpu.pipeline_mode<synchronous>, transform_indices = @transform_2, window_bounds = array<i64: 64, 256>}, {pipeline_mode = #tpu.pipeline_mode<synchronous>, transform_indices = @transform_3, window_bounds = array<i64: 64, 256>}, {pipeline_mode = #tpu.pipeline_mode<synchronous>, transform_indices = @transform_4, window_bounds = array<i64: 8, 4>}, {pipeline_mode = #tpu.pipeline_mode<synchronous>, transform_indices = @transform_5, window_bounds = array<i64: 8, 72>}, {pipeline_mode = #tpu.pipeline_mode<synchronous>, transform_indices = @transform_6, window_bounds = array<i64: 8, 72>}, {pipeline_mode = #tpu.pipeline_mode<synchronous>, transform_indices = @transform_7, window_bounds = array<i64: 8, 3>}, {pipeline_mode = #tpu.pipeline_mode<synchronous>, transform_indices = @transform_8, window_bounds = array<i64: 9, 256>}, {transform_indices = @transform_9, window_bounds = array<i64: 1, 8, 256>}]} {
    %c0 = arith.constant 0 : index
    %c0_0 = arith.constant 0 : index
    %c0_1 = arith.constant 0 : index
    %0 = vector.load %arg1[%c0, %c0_0, %c0_1] : memref<1x4x64xf32, #tpu.memory_space<vmem>>, vector<1x4x64xf32>
    %1 = vector.shape_cast %0 : vector<1x4x64xf32> to vector<4x64xf32>
    %c0_2 = arith.constant 0 : index
    %c0_3 = arith.constant 0 : index
    %2 = vector.load %arg9[%c0_2, %c0_3] : memref<9x256xf32, #tpu.memory_space<vmem>>, vector<9x256xf32>
    %c0_4 = arith.constant 0 : index
    %c0_5 = arith.constant 0 : index
    %3 = vector.load %arg3[%c0_4, %c0_5] : memref<64x256xf32, #tpu.memory_space<vmem>>, vector<64x256xf32>
    %cst = arith.constant dense<0.000000e+00> : vector<4x256xf32>
    %4 = tpu.matmul %1, %3, %cst {dimension_numbers = #tpu.dot_dimension_numbers<[1], [0], [0], [1], [0, 0, 1, 1], [], []>} : vector<4x64xf32>, vector<64x256xf32>, vector<4x256xf32> -> vector<4x256xf32>
    %cst_6 = arith.constant 0.000000e+00 : f32
    %5 = vector.broadcast %cst_6 : f32 to vector<8x512xf32>
    %c0_7 = arith.constant 0 : index
    %c0_8 = arith.constant 0 : index
    %6 = vector.load %arg12[%c0_7, %c0_8] : memref<8x512xf32, #tpu.memory_space<vmem>>, vector<8x512xf32>
    tpu.vector_store %arg12[%c0_7, %c0_8], %5 {strides = array<i32>} : memref<8x512xf32, #tpu.memory_space<vmem>>, vector<8x512xf32>,
    %c0_9 = arith.constant 0 : index
    %c0_10 = arith.constant 0 : index
    %c0_11 = arith.constant 0 : index
    %7 = vector.load %arg2[%c0_9, %c0_10, %c0_11] : memref<1x4x256xf32, #tpu.memory_space<vmem>>, vector<1x4x256xf32>
    %8 = vector.shape_cast %7 : vector<1x4x256xf32> to vector<4x256xf32>
    %9 = tpu.concatenate %4, %8 in 0 : vector<4x256xf32>, vector<4x256xf32> -> vector<8x256xf32>
    %c0_12 = arith.constant 0 : index
    %c128 = arith.constant 128 : index
    %10 = vector.load %arg12[%c0_12, %c128] : memref<8x512xf32, #tpu.memory_space<vmem>>, vector<8x256xf32>
    tpu.vector_store %arg12[%c0_12, %c128], %9 {strides = array<i32>} : memref<8x512xf32, #tpu.memory_space<vmem>>, vector<8x256xf32>,
    %c0_13 = arith.constant 0 : index
    %c0_14 = arith.constant 0 : index
    %11 = vector.load %arg6[%c0_13, %c0_14] : memref<8x72xf32, #tpu.memory_space<vmem>>, vector<8x72xf32>
    %c0_15 = arith.constant 0 : index
    %c111 = arith.constant 111 : index
    %12 = vector.load %arg12[%c0_15, %c111] : memref<8x512xf32, #tpu.memory_space<vmem>>, vector<8x256xf32>
    %13 = vector.extract_strided_slice %2 {offsets = [0, 0], sizes = [1, 256], strides = [1, 1]} : vector<9x256xf32> to vector<1x256xf32>
    %14 = vector.broadcast %13 : vector<1x256xf32> to vector<8x256xf32>
    %15 = arith.mulf %12, %14 : vector<8x256xf32>
    %c0_16 = arith.constant 0 : index
    %c0_17 = arith.constant 0 : index
    %16 = vector.load %arg11[%c0_16, %c0_17] : memref<72x256xf32, #tpu.memory_space<vmem>>, vector<8x256xf32>
    tpu.vector_store %arg11[%c0_16, %c0_17], %15 {strides = array<i32>} : memref<72x256xf32, #tpu.memory_space<vmem>>, vector<8x256xf32>,
    %c0_18 = arith.constant 0 : index
    %c112 = arith.constant 112 : index
    %17 = vector.load %arg12[%c0_18, %c112] : memref<8x512xf32, #tpu.memory_space<vmem>>, vector<8x256xf32>
    %18 = vector.extract_strided_slice %2 {offsets = [1, 0], sizes = [1, 256], strides = [1, 1]} : vector<9x256xf32> to vector<1x256xf32>
    %19 = vector.broadcast %18 : vector<1x256xf32> to vector<8x256xf32>
    %20 = arith.mulf %17, %19 : vector<8x256xf32>
    %c8 = arith.constant 8 : index
    %c0_19 = arith.constant 0 : index
    %21 = vector.load %arg11[%c8, %c0_19] : memref<72x256xf32, #tpu.memory_space<vmem>>, vector<8x256xf32>
    tpu.vector_store %arg11[%c8, %c0_19], %20 {strides = array<i32>} : memref<72x256xf32, #tpu.memory_space<vmem>>, vector<8x256xf32>,
    %c0_20 = arith.constant 0 : index
    %c113 = arith.constant 113 : index
    %22 = vector.load %arg12[%c0_20, %c113] : memref<8x512xf32, #tpu.memory_space<vmem>>, vector<8x256xf32>
    %23 = vector.extract_strided_slice %2 {offsets = [2, 0], sizes = [1, 256], strides = [1, 1]} : vector<9x256xf32> to vector<1x256xf32>
    %24 = vector.broadcast %23 : vector<1x256xf32> to vector<8x256xf32>
    %25 = arith.mulf %22, %24 : vector<8x256xf32>
    %c16 = arith.constant 16 : index
    %c0_21 = arith.constant 0 : index
    %26 = vector.load %arg11[%c16, %c0_21] : memref<72x256xf32, #tpu.memory_space<vmem>>, vector<8x256xf32>
    tpu.vector_store %arg11[%c16, %c0_21], %25 {strides = array<i32>} : memref<72x256xf32, #tpu.memory_space<vmem>>, vector<8x256xf32>,
    %c0_22 = arith.constant 0 : index
    %c127 = arith.constant 127 : index
    %27 = vector.load %arg12[%c0_22, %c127] : memref<8x512xf32, #tpu.memory_space<vmem>>, vector<8x256xf32>
    %28 = vector.extract_strided_slice %2 {offsets = [3, 0], sizes = [1, 256], strides = [1, 1]} : vector<9x256xf32> to vector<1x256xf32>
    %29 = vector.broadcast %28 : vector<1x256xf32> to vector<8x256xf32>
    %30 = arith.mulf %27, %29 : vector<8x256xf32>
    %c24 = arith.constant 24 : index
    %c0_23 = arith.constant 0 : index
    %31 = vector.load %arg11[%c24, %c0_23] : memref<72x256xf32, #tpu.memory_space<vmem>>, vector<8x256xf32>
    tpu.vector_store %arg11[%c24, %c0_23], %30 {strides = array<i32>} : memref<72x256xf32, #tpu.memory_space<vmem>>, vector<8x256xf32>,
    %c0_24 = arith.constant 0 : index
    %c128_25 = arith.constant 128 : index
    %32 = vector.load %arg12[%c0_24, %c128_25] : memref<8x512xf32, #tpu.memory_space<vmem>>, vector<8x256xf32>
    %33 = vector.extract_strided_slice %2 {offsets = [4, 0], sizes = [1, 256], strides = [1, 1]} : vector<9x256xf32> to vector<1x256xf32>
    %34 = vector.broadcast %33 : vector<1x256xf32> to vector<8x256xf32>
    %35 = arith.mulf %32, %34 : vector<8x256xf32>
    %c32 = arith.constant 32 : index
    %c0_26 = arith.constant 0 : index
    %36 = vector.load %arg11[%c32, %c0_26] : memref<72x256xf32, #tpu.memory_space<vmem>>, vector<8x256xf32>
    tpu.vector_store %arg11[%c32, %c0_26], %35 {strides = array<i32>} : memref<72x256xf32, #tpu.memory_space<vmem>>, vector<8x256xf32>,
    %c0_27 = arith.constant 0 : index
    %c129 = arith.constant 129 : index
    %37 = vector.load %arg12[%c0_27, %c129] : memref<8x512xf32, #tpu.memory_space<vmem>>, vector<8x256xf32>
    %38 = vector.extract_strided_slice %2 {offsets = [5, 0], sizes = [1, 256], strides = [1, 1]} : vector<9x256xf32> to vector<1x256xf32>
    %39 = vector.broadcast %38 : vector<1x256xf32> to vector<8x256xf32>
    %40 = arith.mulf %37, %39 : vector<8x256xf32>
    %c40 = arith.constant 40 : index
    %c0_28 = arith.constant 0 : index
    %41 = vector.load %arg11[%c40, %c0_28] : memref<72x256xf32, #tpu.memory_space<vmem>>, vector<8x256xf32>
    tpu.vector_store %arg11[%c40, %c0_28], %40 {strides = array<i32>} : memref<72x256xf32, #tpu.memory_space<vmem>>, vector<8x256xf32>,
    %c0_29 = arith.constant 0 : index
    %c143 = arith.constant 143 : index
    %42 = vector.load %arg12[%c0_29, %c143] : memref<8x512xf32, #tpu.memory_space<vmem>>, vector<8x256xf32>
    %43 = vector.extract_strided_slice %2 {offsets = [6, 0], sizes = [1, 256], strides = [1, 1]} : vector<9x256xf32> to vector<1x256xf32>
    %44 = vector.broadcast %43 : vector<1x256xf32> to vector<8x256xf32>
    %45 = arith.mulf %42, %44 : vector<8x256xf32>
    %c48 = arith.constant 48 : index
    %c0_30 = arith.constant 0 : index
    %46 = vector.load %arg11[%c48, %c0_30] : memref<72x256xf32, #tpu.memory_space<vmem>>, vector<8x256xf32>
    tpu.vector_store %arg11[%c48, %c0_30], %45 {strides = array<i32>} : memref<72x256xf32, #tpu.memory_space<vmem>>, vector<8x256xf32>,
    %c0_31 = arith.constant 0 : index
    %c144 = arith.constant 144 : index
    %47 = vector.load %arg12[%c0_31, %c144] : memref<8x512xf32, #tpu.memory_space<vmem>>, vector<8x256xf32>
    %48 = vector.extract_strided_slice %2 {offsets = [7, 0], sizes = [1, 256], strides = [1, 1]} : vector<9x256xf32> to vector<1x256xf32>
    %49 = vector.broadcast %48 : vector<1x256xf32> to vector<8x256xf32>
    %50 = arith.mulf %47, %49 : vector<8x256xf32>
    %c56 = arith.constant 56 : index
    %c0_32 = arith.constant 0 : index
    %51 = vector.load %arg11[%c56, %c0_32] : memref<72x256xf32, #tpu.memory_space<vmem>>, vector<8x256xf32>
    tpu.vector_store %arg11[%c56, %c0_32], %50 {strides = array<i32>} : memref<72x256xf32, #tpu.memory_space<vmem>>, vector<8x256xf32>,
    %c0_33 = arith.constant 0 : index
    %c145 = arith.constant 145 : index
    %52 = vector.load %arg12[%c0_33, %c145] : memref<8x512xf32, #tpu.memory_space<vmem>>, vector<8x256xf32>
    %53 = vector.extract_strided_slice %2 {offsets = [8, 0], sizes = [1, 256], strides = [1, 1]} : vector<9x256xf32> to vector<1x256xf32>
    %54 = vector.broadcast %53 : vector<1x256xf32> to vector<8x256xf32>
    %55 = arith.mulf %52, %54 : vector<8x256xf32>
    %c64 = arith.constant 64 : index
    %c0_34 = arith.constant 0 : index
    %56 = vector.load %arg11[%c64, %c0_34] : memref<72x256xf32, #tpu.memory_space<vmem>>, vector<8x256xf32>
    tpu.vector_store %arg11[%c64, %c0_34], %55 {strides = array<i32>} : memref<72x256xf32, #tpu.memory_space<vmem>>, vector<8x256xf32>,
    %c0_35 = arith.constant 0 : index
    %c0_36 = arith.constant 0 : index
    %57 = vector.load %arg11[%c0_35, %c0_36] : memref<72x256xf32, #tpu.memory_space<vmem>>, vector<72x256xf32>
    %cst_37 = arith.constant dense<0.000000e+00> : vector<8x256xf32>
    %58 = tpu.matmul %11, %57, %cst_37 {dimension_numbers = #tpu.dot_dimension_numbers<[1], [0], [0], [1], [0, 0, 1, 1], [], []>} : vector<8x72xf32>, vector<72x256xf32>, vector<8x256xf32> -> vector<8x256xf32>
    %c0_38 = arith.constant 0 : index
    %c0_39 = arith.constant 0 : index
    %59 = vector.load %arg8[%c0_38, %c0_39] : memref<8x3xf32, #tpu.memory_space<vmem>>, vector<8x1xf32>
    %60 = vector.broadcast %59 : vector<8x1xf32> to vector<8x256xf32>
    %61 = arith.addf %58, %60 : vector<8x256xf32>
    %cst_40 = arith.constant 0.000000e+00 : f32
    %62 = vector.broadcast %cst_40 : f32 to vector<8x256xf32>
    %63 = arith.cmpf oge, %61, %62 : vector<8x256xf32>
    %cst_41 = arith.constant 2.000000e-01 : f32
    %64 = vector.broadcast %cst_41 : f32 to vector<8x256xf32>
    %65 = arith.mulf %64, %61 : vector<8x256xf32>
    %66 = arith.select %63, %61, %65 : vector<8x256xi1>, vector<8x256xf32>
    %c0_42 = arith.constant 0 : index
    %c128_43 = arith.constant 128 : index
    %67 = vector.load %arg12[%c0_42, %c128_43] : memref<8x512xf32, #tpu.memory_space<vmem>>, vector<8x256xf32>
    tpu.vector_store %arg12[%c0_42, %c128_43], %66 {strides = array<i32>} : memref<8x512xf32, #tpu.memory_space<vmem>>, vector<8x256xf32>,
    %c0_44 = arith.constant 0 : index
    %c0_45 = arith.constant 0 : index
    %68 = vector.load %arg7[%c0_44, %c0_45] : memref<8x72xf32, #tpu.memory_space<vmem>>, vector<8x72xf32>
    %c0_46 = arith.constant 0 : index
    %c111_47 = arith.constant 111 : index
    %69 = vector.load %arg12[%c0_46, %c111_47] : memref<8x512xf32, #tpu.memory_space<vmem>>, vector<8x256xf32>
    %70 = vector.extract_strided_slice %2 {offsets = [0, 0], sizes = [1, 256], strides = [1, 1]} : vector<9x256xf32> to vector<1x256xf32>
    %71 = vector.broadcast %70 : vector<1x256xf32> to vector<8x256xf32>
    %72 = arith.mulf %69, %71 : vector<8x256xf32>
    %c0_48 = arith.constant 0 : index
    %c0_49 = arith.constant 0 : index
    %73 = vector.load %arg11[%c0_48, %c0_49] : memref<72x256xf32, #tpu.memory_space<vmem>>, vector<8x256xf32>
    tpu.vector_store %arg11[%c0_48, %c0_49], %72 {strides = array<i32>} : memref<72x256xf32, #tpu.memory_space<vmem>>, vector<8x256xf32>,
    %c0_50 = arith.constant 0 : index
    %c112_51 = arith.constant 112 : index
    %74 = vector.load %arg12[%c0_50, %c112_51] : memref<8x512xf32, #tpu.memory_space<vmem>>, vector<8x256xf32>
    %75 = vector.extract_strided_slice %2 {offsets = [1, 0], sizes = [1, 256], strides = [1, 1]} : vector<9x256xf32> to vector<1x256xf32>
    %76 = vector.broadcast %75 : vector<1x256xf32> to vector<8x256xf32>
    %77 = arith.mulf %74, %76 : vector<8x256xf32>
    %c8_52 = arith.constant 8 : index
    %c0_53 = arith.constant 0 : index
    %78 = vector.load %arg11[%c8_52, %c0_53] : memref<72x256xf32, #tpu.memory_space<vmem>>, vector<8x256xf32>
    tpu.vector_store %arg11[%c8_52, %c0_53], %77 {strides = array<i32>} : memref<72x256xf32, #tpu.memory_space<vmem>>, vector<8x256xf32>,
    %c0_54 = arith.constant 0 : index
    %c113_55 = arith.constant 113 : index
    %79 = vector.load %arg12[%c0_54, %c113_55] : memref<8x512xf32, #tpu.memory_space<vmem>>, vector<8x256xf32>
    %80 = vector.extract_strided_slice %2 {offsets = [2, 0], sizes = [1, 256], strides = [1, 1]} : vector<9x256xf32> to vector<1x256xf32>
    %81 = vector.broadcast %80 : vector<1x256xf32> to vector<8x256xf32>
    %82 = arith.mulf %79, %81 : vector<8x256xf32>
    %c16_56 = arith.constant 16 : index
    %c0_57 = arith.constant 0 : index
    %83 = vector.load %arg11[%c16_56, %c0_57] : memref<72x256xf32, #tpu.memory_space<vmem>>, vector<8x256xf32>
    tpu.vector_store %arg11[%c16_56, %c0_57], %82 {strides = array<i32>} : memref<72x256xf32, #tpu.memory_space<vmem>>, vector<8x256xf32>,
    %c0_58 = arith.constant 0 : index
    %c127_59 = arith.constant 127 : index
    %84 = vector.load %arg12[%c0_58, %c127_59] : memref<8x512xf32, #tpu.memory_space<vmem>>, vector<8x256xf32>
    %85 = vector.extract_strided_slice %2 {offsets = [3, 0], sizes = [1, 256], strides = [1, 1]} : vector<9x256xf32> to vector<1x256xf32>
    %86 = vector.broadcast %85 : vector<1x256xf32> to vector<8x256xf32>
    %87 = arith.mulf %84, %86 : vector<8x256xf32>
    %c24_60 = arith.constant 24 : index
    %c0_61 = arith.constant 0 : index
    %88 = vector.load %arg11[%c24_60, %c0_61] : memref<72x256xf32, #tpu.memory_space<vmem>>, vector<8x256xf32>
    tpu.vector_store %arg11[%c24_60, %c0_61], %87 {strides = array<i32>} : memref<72x256xf32, #tpu.memory_space<vmem>>, vector<8x256xf32>,
    %c0_62 = arith.constant 0 : index
    %c128_63 = arith.constant 128 : index
    %89 = vector.load %arg12[%c0_62, %c128_63] : memref<8x512xf32, #tpu.memory_space<vmem>>, vector<8x256xf32>
    %90 = vector.extract_strided_slice %2 {offsets = [4, 0], sizes = [1, 256], strides = [1, 1]} : vector<9x256xf32> to vector<1x256xf32>
    %91 = vector.broadcast %90 : vector<1x256xf32> to vector<8x256xf32>
    %92 = arith.mulf %89, %91 : vector<8x256xf32>
    %c32_64 = arith.constant 32 : index
    %c0_65 = arith.constant 0 : index
    %93 = vector.load %arg11[%c32_64, %c0_65] : memref<72x256xf32, #tpu.memory_space<vmem>>, vector<8x256xf32>
    tpu.vector_store %arg11[%c32_64, %c0_65], %92 {strides = array<i32>} : memref<72x256xf32, #tpu.memory_space<vmem>>, vector<8x256xf32>,
    %c0_66 = arith.constant 0 : index
    %c129_67 = arith.constant 129 : index
    %94 = vector.load %arg12[%c0_66, %c129_67] : memref<8x512xf32, #tpu.memory_space<vmem>>, vector<8x256xf32>
    %95 = vector.extract_strided_slice %2 {offsets = [5, 0], sizes = [1, 256], strides = [1, 1]} : vector<9x256xf32> to vector<1x256xf32>
    %96 = vector.broadcast %95 : vector<1x256xf32> to vector<8x256xf32>
    %97 = arith.mulf %94, %96 : vector<8x256xf32>
    %c40_68 = arith.constant 40 : index
    %c0_69 = arith.constant 0 : index
    %98 = vector.load %arg11[%c40_68, %c0_69] : memref<72x256xf32, #tpu.memory_space<vmem>>, vector<8x256xf32>
    tpu.vector_store %arg11[%c40_68, %c0_69], %97 {strides = array<i32>} : memref<72x256xf32, #tpu.memory_space<vmem>>, vector<8x256xf32>,
    %c0_70 = arith.constant 0 : index
    %c143_71 = arith.constant 143 : index
    %99 = vector.load %arg12[%c0_70, %c143_71] : memref<8x512xf32, #tpu.memory_space<vmem>>, vector<8x256xf32>
    %100 = vector.extract_strided_slice %2 {offsets = [6, 0], sizes = [1, 256], strides = [1, 1]} : vector<9x256xf32> to vector<1x256xf32>
    %101 = vector.broadcast %100 : vector<1x256xf32> to vector<8x256xf32>
    %102 = arith.mulf %99, %101 : vector<8x256xf32>
    %c48_72 = arith.constant 48 : index
    %c0_73 = arith.constant 0 : index
    %103 = vector.load %arg11[%c48_72, %c0_73] : memref<72x256xf32, #tpu.memory_space<vmem>>, vector<8x256xf32>
    tpu.vector_store %arg11[%c48_72, %c0_73], %102 {strides = array<i32>} : memref<72x256xf32, #tpu.memory_space<vmem>>, vector<8x256xf32>,
    %c0_74 = arith.constant 0 : index
    %c144_75 = arith.constant 144 : index
    %104 = vector.load %arg12[%c0_74, %c144_75] : memref<8x512xf32, #tpu.memory_space<vmem>>, vector<8x256xf32>
    %105 = vector.extract_strided_slice %2 {offsets = [7, 0], sizes = [1, 256], strides = [1, 1]} : vector<9x256xf32> to vector<1x256xf32>
    %106 = vector.broadcast %105 : vector<1x256xf32> to vector<8x256xf32>
    %107 = arith.mulf %104, %106 : vector<8x256xf32>
    %c56_76 = arith.constant 56 : index
    %c0_77 = arith.constant 0 : index
    %108 = vector.load %arg11[%c56_76, %c0_77] : memref<72x256xf32, #tpu.memory_space<vmem>>, vector<8x256xf32>
    tpu.vector_store %arg11[%c56_76, %c0_77], %107 {strides = array<i32>} : memref<72x256xf32, #tpu.memory_space<vmem>>, vector<8x256xf32>,
    %c0_78 = arith.constant 0 : index
    %c145_79 = arith.constant 145 : index
    %109 = vector.load %arg12[%c0_78, %c145_79] : memref<8x512xf32, #tpu.memory_space<vmem>>, vector<8x256xf32>
    %110 = vector.extract_strided_slice %2 {offsets = [8, 0], sizes = [1, 256], strides = [1, 1]} : vector<9x256xf32> to vector<1x256xf32>
    %111 = vector.broadcast %110 : vector<1x256xf32> to vector<8x256xf32>
    %112 = arith.mulf %109, %111 : vector<8x256xf32>
    %c64_80 = arith.constant 64 : index
    %c0_81 = arith.constant 0 : index
    %113 = vector.load %arg11[%c64_80, %c0_81] : memref<72x256xf32, #tpu.memory_space<vmem>>, vector<8x256xf32>
    tpu.vector_store %arg11[%c64_80, %c0_81], %112 {strides = array<i32>} : memref<72x256xf32, #tpu.memory_space<vmem>>, vector<8x256xf32>,
    %c0_82 = arith.constant 0 : index
    %c0_83 = arith.constant 0 : index
    %114 = vector.load %arg11[%c0_82, %c0_83] : memref<72x256xf32, #tpu.memory_space<vmem>>, vector<72x256xf32>
    %cst_84 = arith.constant dense<0.000000e+00> : vector<8x256xf32>
    %115 = tpu.matmul %68, %114, %cst_84 {dimension_numbers = #tpu.dot_dimension_numbers<[1], [0], [0], [1], [0, 0, 1, 1], [], []>} : vector<8x72xf32>, vector<72x256xf32>, vector<8x256xf32> -> vector<8x256xf32>
    %c0_85 = arith.constant 0 : index
    %c1 = arith.constant 1 : index
    %116 = vector.load %arg8[%c0_85, %c1] : memref<8x3xf32, #tpu.memory_space<vmem>>, vector<8x1xf32>
    %117 = vector.broadcast %116 : vector<8x1xf32> to vector<8x256xf32>
    %118 = arith.addf %115, %117 : vector<8x256xf32>
    %cst_86 = arith.constant 0.000000e+00 : f32
    %119 = vector.broadcast %cst_86 : f32 to vector<8x256xf32>
    %120 = arith.cmpf oge, %118, %119 : vector<8x256xf32>
    %cst_87 = arith.constant 2.000000e-01 : f32
    %121 = vector.broadcast %cst_87 : f32 to vector<8x256xf32>
    %122 = arith.mulf %121, %118 : vector<8x256xf32>
    %123 = arith.select %120, %118, %122 : vector<8x256xi1>, vector<8x256xf32>
    %c0_88 = arith.constant 0 : index
    %c0_89 = arith.constant 0 : index
    %124 = vector.load %arg5[%c0_88, %c0_89] : memref<8x4xf32, #tpu.memory_space<vmem>>, vector<8x4xf32>
    %cst_90 = arith.constant dense<0.000000e+00> : vector<8x64xf32>
    %125 = tpu.matmul %124, %1, %cst_90 {dimension_numbers = #tpu.dot_dimension_numbers<[1], [0], [0], [1], [0, 0, 1, 1], [], []>} : vector<8x4xf32>, vector<4x64xf32>, vector<8x64xf32> -> vector<8x64xf32>
    %c0_91 = arith.constant 0 : index
    %c0_92 = arith.constant 0 : index
    %126 = vector.load %arg4[%c0_91, %c0_92] : memref<64x256xf32, #tpu.memory_space<vmem>>, vector<64x256xf32>
    %cst_93 = arith.constant dense<0.000000e+00> : vector<8x256xf32>
    %127 = tpu.matmul %125, %126, %cst_93 {dimension_numbers = #tpu.dot_dimension_numbers<[1], [0], [0], [1], [0, 0, 1, 1], [], []>} : vector<8x64xf32>, vector<64x256xf32>, vector<8x256xf32> -> vector<8x256xf32>
    %c0_94 = arith.constant 0 : index
    %c2 = arith.constant 2 : index
    %128 = vector.load %arg8[%c0_94, %c2] : memref<8x3xf32, #tpu.memory_space<vmem>>, vector<8x1xf32>
    %129 = vector.broadcast %128 : vector<8x1xf32> to vector<8x256xf32>
    %130 = arith.addf %127, %129 : vector<8x256xf32>
    %131 = arith.addf %123, %130 : vector<8x256xf32>
    %c0_95 = arith.constant 0 : index
    %c0_96 = arith.constant 0 : index
    %c0_97 = arith.constant 0 : index
    %132 = vector.load %arg10[%c0_95, %c0_96, %c0_97] : memref<1x8x256xf32, #tpu.memory_space<vmem>>, vector<1x8x256xf32>
    %133 = vector.shape_cast %132 : vector<1x8x256xf32> to vector<8x256xf32>
    %134 = vector.shape_cast %131 : vector<8x256xf32> to vector<1x8x256xf32>
    tpu.vector_store %arg10[%c0_95, %c0_96, %c0_97], %134 {strides = array<i32>} : memref<1x8x256xf32, #tpu.memory_space<vmem>>, vector<1x8x256xf32>,
    return
  }
  func.func @transform_0(%arg0: i32) -> (i32, i32, i32) {
    %c0_i32 = arith.constant 0 : i32
    %c0_i32_0 = arith.constant 0 : i32
    %c0_i32_1 = arith.constant 0 : i32
    return %arg0, %c0_i32, %c0_i32_0 : i32, i32, i32
  }
  func.func @transform_1(%arg0: i32) -> (i32, i32, i32) {
    %c0_i32 = arith.constant 0 : i32
    %c0_i32_0 = arith.constant 0 : i32
    %c0_i32_1 = arith.constant 0 : i32
    return %arg0, %c0_i32, %c0_i32_0 : i32, i32, i32
  }
  func.func @transform_2(%arg0: i32) -> (i32, i32) {
    %c0_i32 = arith.constant 0 : i32
    %c0_i32_0 = arith.constant 0 : i32
    %c0_i32_1 = arith.constant 0 : i32
    return %c0_i32, %c0_i32_0 : i32, i32
  }
  func.func @transform_3(%arg0: i32) -> (i32, i32) {
    %c0_i32 = arith.constant 0 : i32
    %c0_i32_0 = arith.constant 0 : i32
    %c0_i32_1 = arith.constant 0 : i32
    return %c0_i32, %c0_i32_0 : i32, i32
  }
  func.func @transform_4(%arg0: i32) -> (i32, i32) {
    %c0_i32 = arith.constant 0 : i32
    %c0_i32_0 = arith.constant 0 : i32
    %c0_i32_1 = arith.constant 0 : i32
    return %c0_i32, %c0_i32_0 : i32, i32
  }
  func.func @transform_5(%arg0: i32) -> (i32, i32) {
    %c0_i32 = arith.constant 0 : i32
    %c0_i32_0 = arith.constant 0 : i32
    %c0_i32_1 = arith.constant 0 : i32
    return %c0_i32, %c0_i32_0 : i32, i32
  }
  func.func @transform_6(%arg0: i32) -> (i32, i32) {
    %c0_i32 = arith.constant 0 : i32
    %c0_i32_0 = arith.constant 0 : i32
    %c0_i32_1 = arith.constant 0 : i32
    return %c0_i32, %c0_i32_0 : i32, i32
  }
  func.func @transform_7(%arg0: i32) -> (i32, i32) {
    %c0_i32 = arith.constant 0 : i32
    %c0_i32_0 = arith.constant 0 : i32
    %c0_i32_1 = arith.constant 0 : i32
    return %c0_i32, %c0_i32_0 : i32, i32
  }
  func.func @transform_8(%arg0: i32) -> (i32, i32) {
    %c0_i32 = arith.constant 0 : i32
    %c0_i32_0 = arith.constant 0 : i32
    %c0_i32_1 = arith.constant 0 : i32
    return %c0_i32, %c0_i32_0 : i32, i32
  }
  func.func @transform_9(%arg0: i32) -> (i32, i32, i32) {
    %c0_i32 = arith.constant 0 : i32
    %c0_i32_0 = arith.constant 0 : i32
    %c0_i32_1 = arith.constant 0 : i32
    return %arg0, %c0_i32, %c0_i32_0 : i32, i32, i32
  }
}

</mosaic_0001>

<bundles_post_ra>
// kernel: tpu_custom_call.1
= control target key start
LH: loop header
LB: loop body
LE: loop exit
PB: predicated region body
PF: predicated region fallthrough
CT: control target
= control target key end

     0   :  { %s2742_s0 = inlined_call_operand.hbm [shape: f32[2,4,64], index: 0, kind: input, shape index: {}]   ;;  %s2743_s1 = inlined_call_operand.vmem [shape: f32[2,4,256], index: 1, kind: input, shape index: {}]   ;;  %s2744_s2 = inlined_call_operand.hbm [shape: f32[64,256], index: 2, kind: input, shape index: {}]   ;;  %s2745_s3 = inlined_call_operand.hbm [shape: f32[64,256], index: 3, kind: input, shape index: {}]   ;;  %s2746_s4 = inlined_call_operand.vmem [shape: f32[8,4], index: 4, kind: input, shape index: {}]   ;;  %s2747_s5 = inlined_call_operand.hbm [shape: f32[8,72], index: 5, kind: input, shape index: {}]   ;;  %s2748_s6 = inlined_call_operand.hbm [shape: f32[8,72], index: 6, kind: input, shape index: {}]   ;;  %s2749_s7 = inlined_call_operand.vmem [shape: f32[8,3], index: 7, kind: input, shape index: {}]   ;;  %s2750_s8 = inlined_call_operand.vmem [shape: f32[9,256], index: 8, kind: input, shape index: {}]   ;;  %s2751_s9 = inlined_call_operand.hbm [shape: f32[2,8,256], index: 9, kind: output, shape index: {}]  }
   0x1   :  { %2756 = sst [smem:[#allocation18_spill]] %s2744_s2 }
   0x2   :  { %2757 = sst [smem:[#allocation19_spill]] %s2751_s9 }
   0x3   :  { %14 = vsyncpa [#allocation5], 0 }
   0x4   :  { %16 = vsyncpa [#allocation5 + $0x1], 0 }
   0x5   :  { %17 = vsyncpa [#allocation8], 0 }
   0x6   :  { %18 = vsyncpa [#allocation11], 0 }
   0x7   :  { %19 = vsyncpa [#allocation6], 0 }
   0x8   :  { %21 = vsyncpa [#allocation6 + $0x1], 0  ;;  %s2131_s30 = smov 0   ;;  %s2133_s10 = smov 0  }
   0x9   :  { %s2135_s11 = smov 0   ;;  %s2137_s12 = smov 0  }
   0xa LB: > { %s2060_s13 = smov [#allocation7]   ;;  %s2152_s15 = sadd.s32 4294967295, %s2058_s12   ;;  %s2058_s12 = sphi %s2137_s12, %s2780_s12   ;;  %s2054_s11 = sphi %s2135_s11, %s2779_s11   ;;  %s2050_s10 = sphi %s2133_s10, %s2778_s10   ;;  %s2046_s30 = sphi %s2131_s30, %s2777_s30  }
   0xb   : > { %s269_s14 = sshll.u32 %s2060_s13, 4  ;;  %p1563_p0 = scmp.ge.s32.totalorder %s2058_s12, 1  ;;  %s2157_s14 = int_to_ptr.vmem [resolvable:$true] %s269_s14 }
   0xc   : > { %p2753_p1 = scmp.eq.s32.totalorder %s2152_s15, 0  ;;  %p257_p2 = scmp.lt.s32.totalorder %s2058_s12, 3 }
   0xd   : > { %s2061_s17 = smov [#allocation10]   ;;  %s2062_s20 = smov [#allocation9]  }
   0xe   : > { %p2159_p3 = pnand %p1563_p0, %p257_p2  ;;  %s299_s18 = sshll.u32 %s2061_s17, 4  ;;  %s2172_s18 = int_to_ptr.vmem [resolvable:$true] %s299_s18 }
   0xf   : > { %s282_s21 = sshll.u32 %s2062_s20, 4  ;;  %s2760_s2 = sld [smem:[#allocation18_spill]]  ;;  %s2174_s21 = int_to_ptr.vmem [resolvable:$true] %s282_s21 }
  0x10   : > { %s2758_s16 = scalar_select %p2159_p3, 1, 0 }
  0x11   : > { %p1686_p5 = pneg %p2159_p3 }
  0x13   : > { %p2168_p6 = pnand %p1686_p5, %p2753_p1 }
  0x15   : > { %s1842_s24 = scalar_lea.hbm %s2760_s2, 2048  ;;  %p2184_p8 = pneg %p2168_p6 }
  0x16   : > { %p1843_p7 = scmp.ne.s32.totalorder %s2760_s2, %s1842_s24  ;;  %p1849_p11 = scmp.lt.u32.totalorder %s1842_s24, %s2760_s2 }
  0x18   : > { %p1845_p9 = pnand %p2184_p8, %p1843_p7 }
  0x1a   : > { %p1846_p10 = pneg %p1845_p9 }
  0x1c   : > { %p1851_p12 = pnand %p1849_p11, %p1846_p10 }
  0x1e   : > { %1854 = shalt.err (!%p1851_p12)
}
  0x1f   : > { %s1855_s13 = scalar_lea.vmem %s2157_s14, 2048  ;;  %p1863_p5 = scmp.lt.s32.totalorder %s2157_s14, %s2157_s14 }
  0x20   : > { %p1856_p13 = scmp.ne.s32.totalorder %s2157_s14, %s1855_s13  ;;  %p1864_p4 = scmp.lt.s32.totalorder %s1855_s13, %s1855_s13 }
  0x22   : > { %p1858_p0 = pnand %p1856_p13, %p2184_p8  ;;  %p1865_p7 = por %p1864_p4, %p1863_p5 }
  0x24   : > { %p1859_p2 = pneg %p1858_p0 }
  0x26   : > { %p1866_p9 = pnand %p1865_p7, %p1859_p2 }
  0x28   : > { %1869 = shalt.err (!%p1866_p9)
}
  0x29   : > { %s2063_s17 = smov 256   ;;  %s2064_s20 = smov 16  }
  0x2a   : > { %1689 = dma.hbm_to_vmem [thread:$0]  (!%p2168_p6), %s2760_s2, 2048, %s2157_s14, [#allocation8], %s2063_s17, %s2063_s17, %s2064_s20  }
  0x2b   : > { %s1870_s26 = scalar_lea.hbm %s2747_s5, 128 }
  0x2c   : > { %p1871_p4 = scmp.ne.s32.totalorder %s2747_s5, %s1870_s26  ;;  %p1877_p12 = scmp.lt.u32.totalorder %s1870_s26, %s2747_s5 }
  0x2e   : > { %p1873_p10 = pnand %p1871_p4, %p2184_p8 }
  0x30   : > { %p1874_p11 = pneg %p1873_p10 }
  0x32   : > { %p1879_p13 = pnand %p1877_p12, %p1874_p11 }
  0x34   : > { %1882 = shalt.err (!%p1879_p13)
}
  0x35   : > { %s1883_s14 = scalar_lea.vmem %s2172_s18, 128  ;;  %p1891_p7 = scmp.lt.s32.totalorder %s2172_s18, %s2172_s18 }
  0x36   : > { %p1884_p0 = scmp.ne.s32.totalorder %s2172_s18, %s1883_s14  ;;  %p1892_p9 = scmp.lt.s32.totalorder %s1883_s14, %s1883_s14 }
  0x38   : > { %p1886_p2 = pnand %p1884_p0, %p2184_p8  ;;  %p1893_p4 = por %p1892_p9, %p1891_p7 }
  0x3a   : > { %p1887_p5 = pneg %p1886_p2 }
  0x3c   : > { %p1894_p10 = pnand %p1893_p4, %p1887_p5 }
  0x3e   : > { %1897 = shalt.err (!%p1894_p10)
}
  0x3f   : > { %1695 = dma.hbm_to_vmem [thread:$0]  (!%p2168_p6), %s2747_s5, 128, %s2172_s18, [#allocation11]  }
  0x40   : > { %s1898_s25 = scalar_lea.hbm %s2745_s3, 2048 }
  0x41   : > { %p1899_p11 = scmp.ne.s32.totalorder %s2745_s3, %s1898_s25  ;;  %p1905_p0 = scmp.lt.u32.totalorder %s1898_s25, %s2745_s3 }
  0x43   : > { %p1901_p12 = pnand %p1899_p11, %p2184_p8 }
  0x45   : > { %p1902_p13 = pneg %p1901_p12 }
  0x47   : > { %p1907_p2 = pnand %p1905_p0, %p1902_p13 }
  0x49   : > { %1910 = shalt.err (!%p1907_p2)
}
  0x4a   : > { %s1911_s18 = scalar_lea.vmem %s2174_s21, 2048  ;;  %p1919_p4 = scmp.lt.s32.totalorder %s2174_s21, %s2174_s21 }
  0x4b   : > { %p1912_p5 = scmp.ne.s32.totalorder %s2174_s21, %s1911_s18  ;;  %p1920_p10 = scmp.lt.s32.totalorder %s1911_s18, %s1911_s18 }
  0x4d   : > { %p1914_p7 = pnand %p1912_p5, %p2184_p8  ;;  %p1921_p11 = por %p1920_p10, %p1919_p4 }
  0x4f   : > { %p1915_p9 = pneg %p1914_p7 }
  0x51   : > { %p1922_p12 = pnand %p1921_p11, %p1915_p9 }
  0x53   : > { %1925 = shalt.err (!%p1922_p12)
}
  0x54   : > { %1692 = dma.hbm_to_vmem [thread:$0]  (!%p2168_p6), %s2745_s3, 2048, %s2174_s21, [#allocation8], %s2063_s17, %s2063_s17, %s2064_s20  }
  0x55   : > { %s2065_s22 = smov [#allocation12]   ;;  %s1926_s26 = scalar_lea.hbm %s2748_s6, 128 }
  0x56   : > { %s310_s23 = sshll.u32 %s2065_s22, 4  ;;  %p1927_p13 = scmp.ne.s32.totalorder %s2748_s6, %s1926_s26  ;;  %s311_s23 = int_to_ptr.vmem [resolvable:$true] %s310_s23 }
  0x57   : > { %p1933_p5 = scmp.lt.u32.totalorder %s1926_s26, %s2748_s6 }
  0x58   : > { %p1929_p0 = pnand %p1927_p13, %p2184_p8 }
  0x5a   : > { %p1930_p2 = pneg %p1929_p0 }
  0x5c   : > { %p1935_p7 = pnand %p1933_p5, %p1930_p2 }
  0x5e   : > { %1938 = shalt.err (!%p1935_p7)
}
  0x5f   : > { %s1939_s21 = scalar_lea.vmem %s311_s23, 128  ;;  %p1947_p11 = scmp.lt.s32.totalorder %s311_s23, %s311_s23 }
  0x60   : > { %p1940_p9 = scmp.ne.s32.totalorder %s311_s23, %s1939_s21  ;;  %p1948_p12 = scmp.lt.s32.totalorder %s1939_s21, %s1939_s21 }
  0x62   : > { %p1942_p4 = pnand %p1940_p9, %p2184_p8  ;;  %p1949_p1 = por %p1948_p12, %p1947_p11 }
  0x64   : > { %p1943_p10 = pneg %p1942_p4 }
  0x66   : > { %p1950_p3 = pnand %p1949_p1, %p1943_p10 }
  0x68   : > { %1953 = shalt.err (!%p1950_p3)
}
  0x69   : > { %1698 = dma.hbm_to_vmem [thread:$0]  (!%p2168_p6), %s2748_s6, 128, %s311_s23, [#allocation11]  }
  0x6a   : > { %s1562_s27 = sadd.s32 4294967294, %s2058_s12   ;;  %s2277_s19 = sadd.s32 1, %s2058_s12  }
  0x6b   : > { %s31_s14 = ssub.s32 %s2058_s12, %s2277_s19  ;;  %s34_s9 = sadd.s32 1, %s2054_s11 }
  0x6c   : > { %p32_p1 = scmp.eq.s32.totalorder %s31_s14, 0  ;;  %p41_p3 = scmp.ne.s32.totalorder %s2054_s11, %s2050_s10 }
  0x6d   : > { %p42_p8 = scmp.eq.s32.totalorder %s2058_s12, 0  ;;  %p47_p13 = scmp.ne.s32.totalorder %s2050_s10, %s2046_s30 }
  0x6e   : > { %s2288_s22 = scalar_select %p32_p1, %s2054_s11, %s34_s9  }
  0x6f   : > { %p2290_p0 = por %p42_p8, %p41_p3  ;;  %p2763_p2 = scmp.eq.s32.totalorder %s2152_s15, 0 }
  0x70   : > { %p244_p5 = scmp.eq.s32.totalorder %s2152_s15, 1  ;;  %p250_p7 = scmp.eq.s32.totalorder %s1562_s27, 1 }
  0x71   : > { %p2296_p6 = por %p2763_p2, %p47_p13  ;;  %p1711_p9 = scmp.lt.s32.totalorder %s2058_s12, 2 }
  0x72   : > { %s327_s25 = sand.u32 1, %s2054_s11   ;;  %p2303_p4 = por %p244_p5, %p41_p3 }
  0x73   : > { %p2307_p10 = por %p250_p7, %p47_p13  ;;  %s1569_s29 = sshll.u32 %s327_s25, 2 }
  0x74   : > { %s2765_s26 = scalar_select %p2303_p4, 1, 0 }
  0x75   : > { %s2766_s28 = scalar_select %p2307_p10, 1, 0 }
  0x76   : > { %s1570_s13 = sshll.u32 %s2058_s12, 6  ;;  %s331_s20 = scalar_lea.vmem [#allocation4], %s1569_s29 }
  0x77   : > { %s2315_s17 = scalar_lea.hbm %s2742_s0, %s1570_s13  ;;  %s338_s27 = sshll.u32 %s331_s20, 4  ;;  %s2317_s27 = int_to_ptr.vmem [resolvable:$true] %s338_s27 }
  0x78   : > { %p2321_p11 = pnand %p1711_p9, %p2290_p0  ;;  %s328_s9 = scalar_lea.sflag [#allocation5], %s327_s25 }
  0x79   : > { %s1954_s2 = scalar_lea.hbm %s2315_s17, 64  ;;  %s1959_s18 = scalar_lea.hbm %s2742_s0, 128 }
  0x7a   : > { %p1955_p12 = scmp.ne.s32.totalorder %s2315_s17, %s1954_s2  ;;  %p1956_p1 = pneg %p2321_p11 }
  0x7b   : > { %p1960_p13 = scmp.lt.u32.totalorder %s2315_s17, %s2742_s0  ;;  %p1961_p0 = scmp.lt.u32.totalorder %s1959_s18, %s1954_s2 }
  0x7c   : > { %p1957_p3 = pnand %p1956_p1, %p1955_p12  ;;  %p1963_p5 = scmp.lt.u32.totalorder %s1954_s2, %s2315_s17 }
  0x7d   : > { %p1962_p2 = por %p1961_p0, %p1960_p13 }
  0x7e   : > { %p1958_p8 = pneg %p1957_p3 }
  0x7f   : > { %p1964_p7 = por %p1963_p5, %p1962_p2 }
  0x81   : > { %p1965_p9 = pnand %p1964_p7, %p1958_p8 }
  0x83   : > { %1968 = shalt.err (!%p1965_p9)
}
  0x84   : > { %s1969_s25 = scalar_lea.vmem %s2317_s27, 64  ;;  %s2066_s20 = smov [#allocation4]  }
  0x85   : > { %p1970_p12 = scmp.ne.s32.totalorder %s2317_s27, %s1969_s25  ;;  %s1974_s29 = sshll.u32 %s2066_s20, 4  ;;  %s1975_s29 = int_to_ptr.vmem [resolvable:$false] %s1974_s29 }
  0x86   : > { %s1976_s13 = scalar_lea.vmem %s1975_s29, 128  ;;  %p1977_p4 = scmp.lt.s32.totalorder %s2317_s27, %s1975_s29 }
  0x87   : > { %p1972_p3 = pnand %p1970_p12, %p1956_p1  ;;  %p1978_p13 = scmp.lt.s32.totalorder %s1976_s13, %s1969_s25 }
  0x89   : > { %p1973_p10 = pneg %p1972_p3  ;;  %p1979_p0 = por %p1978_p13, %p1977_p4 }
  0x8b   : > { %p1980_p2 = pnand %p1979_p0, %p1973_p10 }
  0x8d   : > { %1983 = shalt.err (!%p1980_p2)
}
  0x8e   : > { %1702 = dma.hbm_to_vmem [thread:$0]  (!%p2321_p11), %s2315_s17, 64, %s2317_s27, %s328_s9  }
  0x8f   : > { %p2768_p8 = scmp.ne.s32.totalorder %s2758_s16, 0 }
  0x90   : > { %s2353_s2 = sand.u32 (!%p2768_p8), 1, %s2050_s10  }
  0x91   : > { %355 = sbr.rel (%p2768_p8) target bundleno = 1136 (0x470), region = 56  ;;  %s1572_s18 = sshll.u32 (!%p2768_p8), %s2353_s2, 2 }
  0x92   : > { %s358_s24 = scalar_lea.sflag (!%p2768_p8), [#allocation5], %s2353_s2  ;;  %s2357_s21 = scalar_lea.vmem (!%p2768_p8), [#allocation4], %s1572_s18 }
  0x98   : > { %2029 = dma.done.wait (%p2296_p6), %s358_s24, 64  }
  0x99   : > { %2031 = vsyncadd (%p2296_p6), %s358_s24, 4294967232  ;;  %p2769_p4 = scmp.eq.s32.totalorder %s2152_s15, 0 }
  0x9b   : > { %2033 = dma.done.wait (%p2769_p4), [#allocation8], 4096   ;;  %p2770_p10 = pmov %p2769_p4 }
  0x9c   : > { %p2771_p11 = pmov %p2769_p4 }
  0x9d   : > { %2035 = vsyncadd (%p2770_p10), [#allocation8], 4294963200 }
  0x9e   : > { %2037 = dma.done.wait (%p2771_p11), [#allocation11], 256   ;;  %p2772_p1 = pmov %p2769_p4 }
  0x9f   : > { %v2067_v0 = vmov 0.0   ;;  %v535_v1 = vlaneseq  ;;  %v428_v3 = vld [vmem:[#allocation7 + $0x8] sm:$0xff]  ;;  %v430_v4 = vld [vmem:[#allocation7 + $0x18] sm:$0xff]  ;;  %v427_v5 = vld [vmem:[#allocation7] sm:$0xff]  ;;  %s2068_s14 = smov 112   ;;  %s2069_s9 = smov 111  }
  0xa0   : > { %2039 = vsyncadd (%p2772_p1), [#allocation11], 4294967040  ;;  %511 = vmatprep.mubr.f32.mxu0 %v2067_v0  ;;  %958 = vmatprep.mubr.f32.mxu1 %v2067_v0  ;;  %v1602_v6 = vpack.c.bf16 %v430_v4, %v428_v3  ;;  %v429_v7 = vld [vmem:[#allocation7 + $0x10] sm:$0xff]  ;;  %v432_v8 = vld [vmem:[#allocation7 + $0x28] sm:$0xff]  ;;  %vm443_vm0 = vcmask 523264   ;;  %s2070_s25 = smov 113  }
  0xa1   : > { %v2373_v2 = vshrl.u32 %v535_v1, 7  ;;  %v434_v9 = vld [vmem:[#allocation7 + $0x38] sm:$0xff]  ;;  %v1604_v10 = vpack.c.bf16 %v429_v7, %v427_v5  ;;  %v431_v12 = vld [vmem:[#allocation7 + $0x20] sm:$0xff]  ;;  %v433_v13 = vld [vmem:[#allocation7 + $0x30] sm:$0xff]  ;;  %s2071_s20 = smov 127   ;;  %s2072_s29 = smov 1  }
  0xa2   : > { %v1606_v11 = vpack.c.bf16 %v434_v9, %v432_v8  ;;  %v436_v14 = vld [vmem:[#allocation7 + $0x48] sm:$0xff]  ;;  %1603 = vmatprep.subr.bf16.mxu0 %v1602_v6  ;;  %v438_v17 = vld [vmem:[#allocation7 + $0x58] sm:$0xff]  ;;  %v1608_v18 = vpack.c.bf16 %v433_v13, %v431_v12  ;;  %v435_v20 = vld [vmem:[#allocation7 + $0x40] sm:$0xff]  ;;  %s2073_s13 = smov 15   ;;  %s2074_s18 = smov 16   ;;  %v2076_v58 = vmov 0  }
  0xa3   : > { %v578_v15 = vsub.s32 1, %v2373_v2  ;;  %v537_v16 = vsub.s32 0, %v2373_v2  ;;  %1605 = vmatpush1.bf16.msra.mxu0 %v1604_v10  ;;  %v1610_v19 = vpack.c.bf16 %v438_v17, %v436_v14  ;;  %v437_v21 = vld [vmem:[#allocation7 + $0x50] sm:$0xff]  ;;  %v2380_v22 = vld [vmem:[%s2750_s8] sm:$0xff]  ;;  %v440_v23 = vld [vmem:[#allocation7 + $0x68] sm:$0xff]  ;;  %v619_v30 = vsub.s32 2, %v2373_v2  ;;  %1803 = vset.pattern.permute.xlu1 %v2076_v58 }
  0xa4   : > { %1607 = vmatprep.subr.bf16.mxu0 %v1606_v11  ;;  %v442_v24 = vld [vmem:[#allocation7 + $0x78] sm:$0xff]  ;;  %v2387_v27 = vld [vmem:[%s2750_s8 + $0x8] sm:$0xff]  ;;  %v1612_v28 = vpack.c.bf16 %v437_v21, %v435_v20  ;;  %v441_v33 = vld [vmem:[#allocation7 + $0x70] sm:$0xff]  ;;  %v660_v37 = vsub.s32 3, %v2373_v2  ;;  %v715_v41 = vsub.s32 5, %v2373_v2  ;;  %v754_v44 = vsub.s32 6, %v2373_v2 }
  0xa5   : > { %v579_v25 = vrot.slane %v2380_v22, %v578_v15  ;;  %v538_v26 = vrot.slane %v2380_v22, %v537_v16  ;;  %v583_v29 = vrot.slane %v2387_v27, %v578_v15  ;;  %v1614_v31 = vpack.c.bf16 %v442_v24, %v440_v23  ;;  %v439_v32 = vld [vmem:[#allocation7 + $0x60] sm:$0xff]  ;;  %v2400_v39 = vld [vmem:[%s2357_s21] sm:$0xf]  ;;  %v1582_v51 = vld [vmem:[%s2750_s8 + $0x18] ss:$0 sm:$0xff]  ;;  %s2075_s17 = smov 17  }
  0xa6   : > { %v542_v34 = vrot.slane %v2387_v27, %v537_v16  ;;  %v1616_v35 = vpack.c.bf16 %v441_v33, %v439_v32  ;;  %v624_v36 = vrot.slane %v2387_v27, %v619_v30  ;;  %v620_v38 = vrot.slane %v2380_v22, %v619_v30  ;;  %v1581_v52 = vld [vmem:[%s2750_s8 + $0x10] ss:$0 sm:$0xff]  ;;  %p417_p6 = scmp.lt.s32.totalorder %s2152_s15, 1  ;;  %v2566_v58 = vld [vmem:[%s2749_s7] sm:$0xff]  ;;  %p2774_p7 = scmp.ne.s32.totalorder %s2765_s26, 0 }
  0xa7   : > { %1609 = vmatpush1.bf16.msra.mxu0 %v1608_v18  ;;  %586 = vrot.lane.b32.xlu1 %v579_v25, %s2068_s14  ;;  %v665_v40 = vrot.slane %v2387_v27, %v660_v37  ;;  %v661_v42 = vrot.slane %v2380_v22, %v660_v37  ;;  %v720_v43 = vrot.slane %v2387_v27, %v715_v41  ;;  %v793_v47 = vsub.s32 7, %v2373_v2 }
  0xa8   : > { %1611 = vmatprep.subr.bf16.mxu0 %v1610_v19  ;;  %545 = vrot.lane.b32.xlu0 %v538_v26, %s2069_s9  ;;  %v716_v45 = vrot.slane %v2380_v22, %v715_v41  ;;  %v759_v46 = vrot.slane %v2387_v27, %v754_v44  ;;  %v755_v48 = vrot.slane %v2380_v22, %v754_v44  ;;  %s418_s27 = scalar_select %p417_p6, %s2152_s15, 1  ;;  %vm672_vm1 = vcmask 1039360  }
  0xa9   : > { %v798_v49 = vrot.slane %v2387_v27, %v793_v47  ;;  %v794_v50 = vrot.slane %v2380_v22, %v793_v47  ;;  %vm590_vm2 = vcmask 916480   ;;  %vm549_vm3 = vcmask 908288  }
  0xaa   : > { %s1593_s24 = sshll.u32 %s418_s27, 3  ;;  %vm631_vm4 = vcmask 924672   ;;  %vm526_vm5 = vcmask 1043456   ;;  %vm689_vm6 = vcmask 7168   ;;  %vm607_vm7 = vcmask 130048   ;;  %s2080_s27 = smov [#allocation13]  }
  0xab   : > { %1613 = vmatpush1.bf16.msra.mxu0 %v1612_v28  ;;  %588 = vrot.lane.b32.xlu1 %v583_v29, %s2068_s14  ;;  %s421_s23 = scalar_lea.vmem %s2743_s1, %s1593_s24  ;;  %vm648_vm8 = vcmask 121856   ;;  %vm566_vm9 = vcmask 138240   ;;  %vm890_vm10 = vcmask 588800   ;;  %vm2077_vm11 = vmmov 0   ;;  %s1988_s24 = sshll.u32 %s2080_s27, 4  ;;  %s1989_s24 = int_to_ptr.vmem [resolvable:$false] %s1988_s24 }
  0xac   : > { %1615 = vmatprep.subr.bf16.mxu0 %v1614_v31  ;;  %547 = vrot.lane.b32.xlu0 %v542_v34, %s2069_s9  ;;  %v522_v4 = vld [vmem:[%s421_s23] sm:$0xff]  ;;  %vm1253_vm12 = vcmask 31744   ;;  %s1428_s23 = scalar_lea.sflag [#allocation6], %s2353_s2  ;;  %s1990_s21 = scalar_lea.vmem %s1989_s24, 512 }
  0xad   : > { %v524_v7 = vcombine.low %v522_v4, %v522_v4 }
  0xaf   : > { %1617 = vmatpush1.bf16.msra.mxu0 %v1616_v35  ;;  %629 = vrot.lane.b32.xlu1 %v624_v36, %s2070_s25 }
  0xb0   : > { %627 = vrot.lane.b32.xlu0 %v620_v38, %s2070_s25 }
  0xb2   : > { %1580 = vmatmul.mubr.msk.f32.vlgmr.msra.gmra.mrb[0].mxu0 %vm443_vm0, %v2400_v39 }
  0xb3   : > { %670 = vrot.lane.b32.xlu1 %v665_v40, %s2071_s20  ;;  %1239 = vmatprep.mubr.f32.mxu0 %v2067_v0 }
  0xb4   : > { %668 = vrot.lane.b32.xlu0 %v661_v42, %s2071_s20 }
  0xb7   : > { %725 = vrot.lane.b32.xlu1 %v720_v43, %s2072_s29 }
  0xb8   : > { %723 = vrot.lane.b32.xlu0 %v716_v45, %s2072_s29 }
  0xbb   : > { %764 = vrot.lane.b32.xlu1 %v759_v46, %s2073_s13 }
  0xbc   : > { %762 = vrot.lane.b32.xlu0 %v755_v48, %s2073_s13 }
  0xbf   : > { %803 = vrot.lane.b32.xlu1 %v798_v49, %s2074_s18 }
  0xc0   : > { %801 = vrot.lane.b32.xlu0 %v794_v50, %s2074_s18 }
  0xc3   : > { %842 = vrot.lane.b32.xlu1 %v1582_v51, %s2075_s17 }
  0xc4   : > { %840 = vrot.lane.b32.xlu0 %v1581_v52, %s2075_s17 }
 0x119   : > { %v587_v53 = vpop.permute.xlu1 %586 }
 0x11a   : > { %v2434_v54 = vmul.f32 0.0, %v587_v53  ;;  %v546_v55 = vpop.permute.xlu0 %545 }
 0x11b   : > { %v2436_v56 = vmul.f32 0.0, %v546_v55 }
 0x11c   : > { %601 = vrot.lane.b32.xlu1 %v2434_v54, %s2074_s18 }
 0x11d   : > { %560 = vrot.lane.b32.xlu0 %v2436_v56, %s2075_s17  ;;  %v2452_v63 = vpop.permute.xlu1 %588 }
 0x11e   : > { %v2442_v57 = vpop.permute.xlu0 %547  ;;  %v2471_v10 = vsel %vm590_vm2, %v587_v53, %v2452_v63 }
 0x11f   : > { %v2475_v11 = vsel %vm549_vm3, %v546_v55, %v2442_v57 }
 0x121   : > { %v2456_v1 = vpop.permute.xlu1 %629 }
 0x122   : > { %v628_v59 = vpop.permute.xlu0 %627 }
 0x123   : > { %v2444_v60 = vmul.f32 0.0, %v628_v59  ;;  %v2479_v12 = vsel %vm631_vm4, %v628_v59, %v2456_v1 }
 0x125   : > { %642 = vrot.lane.b32.xlu0 %v2444_v60, %s2073_s13  ;;  %v2458_v3 = vpop.permute.xlu1 %670 }
 0x126   : > { %v669_v61 = vpop.permute.xlu0 %668 }
 0x127   : > { %v2448_v62 = vmul.f32 0.0, %v669_v61  ;;  %v2467_v8 = vsel %vm672_vm1, %v669_v61, %v2458_v3 }
 0x129   : > { %683 = vrot.lane.b32.xlu1 %v2448_v62, %s2072_s29  ;;  %v726_v5 = vpop.permute.xlu1 %725 }
 0x12a   : > { %v2463_v6 = vpop.permute.xlu0 %723  ;;  %v2519_v36 = vmul.f32 0.0, %v726_v5 }
 0x12b   : > { %v2511_v34 = vsel %vm689_vm6, %v2463_v6, %v726_v5 }
 0x12d   : > { %v765_v18 = vpop.permute.xlu1 %764 }
 0x12e   : > { %v2491_v19 = vpop.permute.xlu0 %762  ;;  %v2537_v44 = vmul.f32 0.0, %v765_v18 }
 0x12f   : > { %v2533_v43 = vsel %vm648_vm8, %v2491_v19, %v765_v18 }
 0x131   : > { %v804_v32 = vpop.permute.xlu1 %803 }
 0x132   : > { %v2507_v33 = vpop.permute.xlu0 %801  ;;  %v2521_v37 = vmul.f32 0.0, %v804_v32 }
 0x133   : > { %v2515_v35 = vsel %vm607_vm7, %v2507_v33, %v804_v32 }
 0x135   : > { %v843_v48 = vpop.permute.xlu1 %842 }
 0x136   : > { %v2543_v49 = vpop.permute.xlu0 %840  ;;  %v2554_v53 = vmul.f32 0.0, %v843_v48 }
 0x137   : > { %v2552_v52 = vsel %vm566_vm9, %v2543_v49, %v843_v48 }
 0x185   : > { %v513_v9 = vpop.f32.mrb[0].mxu0 }
 0x186   : > { %v2482_v13 = vsel %vm526_vm5, %v513_v9, %v524_v7  ;;  %v515_v14 = vpop.f32.mrb[1].mxu0 }
 0x187   : > { %v2485_v15 = vsel %vm526_vm5, %v515_v14, %v522_v4  ;;  %v596_v16 = vmul.f32 %v2471_v10, %v2482_v13  ;;  %v555_v17 = vmul.f32 %v2475_v11, %v2482_v13  ;;  %v678_v23 = vmul.f32 %v2467_v8, %v2482_v13 }
 0x188   : > { %v597_v20 = vmul.f32 %v2452_v63, %v2485_v15  ;;  %v556_v21 = vmul.f32 %v2442_v57, %v2485_v15  ;;  %v679_v24 = vmul.f32 %v2458_v3, %v2485_v15  ;;  %v637_v25 = vmul.f32 %v2479_v12, %v2482_v13 }
 0x189   : > { %v638_v26 = vmul.f32 %v2456_v1, %v2485_v15  ;;  %v731_v38 = vmul.f32 %v2463_v6, %v2482_v13  ;;  %v770_v40 = vmul.f32 %v2491_v19, %v2482_v13  ;;  %v810_v41 = vmul.f32 %v2515_v35, %v2485_v15 }
 0x18a   : > { %v1773_v28 = vpack.i.bf16 %v597_v20, %v596_v16  ;;  %v1768_v29 = vpack.i.bf16 %v556_v21, %v555_v17  ;;  %v1783_v30 = vpack.i.bf16 %v679_v24, %v678_v23  ;;  %v732_v42 = vmul.f32 %v2511_v34, %v2485_v15 }
 0x18b   : > { %v1778_v31 = vpack.i.bf16 %v638_v26, %v637_v25  ;;  %v1798_v45 = vpack.i.bf16 %v2521_v37, %v810_v41  ;;  %v771_v47 = vmul.f32 %v2533_v43, %v2485_v15  ;;  %v809_v50 = vmul.f32 %v2507_v33, %v2482_v13 }
 0x18c   : > { %1774 = vrot.lane.b32.xlu1 %v1773_v28, %s2074_s18  ;;  %1769 = vrot.lane.b32.xlu0 %v1768_v29, %s2075_s17  ;;  %v1788_v46 = vpack.i.bf16 %v2519_v36, %v732_v42  ;;  %v849_v55 = vmul.f32 %v2552_v52, %v2485_v15  ;;  %v848_v59 = vmul.f32 %v2543_v49, %v2482_v13 }
 0x18d   : > { %v1793_v51 = vpack.i.bf16 %v2537_v44, %v771_v47 }
 0x18e   : > { %v602_v4 = vpop.permute.xlu1 %601 }
 0x18f   : > { %v561_v61 = vpop.permute.xlu0 %560 }
 0x190   : > { %1784 = vrot.lane.b32.xlu1 %v1783_v30, %s2072_s29  ;;  %1779 = vrot.lane.b32.xlu0 %v1778_v31, %s2073_s13  ;;  %v700_v31 = vsub.s32 4, %v2373_v2 }
 0x192   : > { %v2590_v48 = vrot.slane %v2387_v27, %v700_v31 }
 0x194   : > { %737 = vrot.lane.b32.xlu1 %v731_v38, %s2071_s20  ;;  %776 = vrot.lane.b32.xlu0 %v770_v40, %s2070_s25 }
 0x197   : > { %v643_v5 = vpop.permute.xlu0 %642 }
 0x198   : > { %1799 = vrot.lane.b32.xlu1 %v1798_v45, %s2068_s14  ;;  %1789 = vrot.lane.b32.xlu0 %v1788_v46, %s2071_s20 }
 0x19b   : > { %v684_v7 = vpop.permute.xlu1 %683 }
 0x19c   : > { %815 = vrot.lane.b32.xlu1 %v809_v50, %s2068_s14  ;;  %1794 = vrot.lane.b32.xlu0 %v1793_v51, %s2070_s25  ;;  %v2593_v50 = vrot.slane %v2380_v22, %v700_v31 }
 0x1a0   : > { %858 = vrot.lane.b32.xlu1 %v2554_v53, %s2069_s9  ;;  %856 = vrot.lane.b32.xlu0 %v849_v55, %s2069_s9 }
 0x1a4   : > { %887 = vperm.xlu1 %1803, %v2566_v58   ;;  %854 = vrot.lane.b32.xlu0 %v848_v59, %s2069_s9 }
 0x1a8   : > { %1004 = vrot.lane.b32.xlu1 %v2434_v54, %s2074_s18  ;;  %983 = vrot.lane.b32.xlu0 %v2436_v56, %s2075_s17 }
 0x1ac   : > { %1046 = vrot.lane.b32.xlu1 %v2448_v62, %s2072_s29  ;;  %1025 = vrot.lane.b32.xlu0 %v2444_v60, %s2073_s13 }
 0x1fe   : > { %v1775_v9 = vpop.permute.xlu1 %1774  ;;  %v1770_v14 = vpop.permute.xlu0 %1769 }
 0x1ff   : > { %v1777_v16 = vunpack.i.h.bf16 %v1775_v9  ;;  %v1776_v17 = vunpack.i.l.bf16 %v1775_v9  ;;  %v1772_v18 = vunpack.i.h.bf16 %v1770_v14  ;;  %v1771_v20 = vunpack.i.l.bf16 %v1770_v14 }
 0x201   : > { %v568_v54 = vsel %vm566_vm9, %v1771_v20, %v1772_v18  ;;  %v609_v56 = vsel %vm607_vm7, %v1776_v17, %v1777_v16  ;;  %v567_v21 = vsel %vm566_vm9, %v561_v61, %v1771_v20  ;;  %v608_v62 = vsel %vm607_vm7, %v602_v4, %v1776_v17 }
 0x202   : > { %v1785_v23 = vpop.permute.xlu1 %1784  ;;  %v1780_v60 = vpop.permute.xlu0 %1779  ;;  %v1618_v24 = vpack.c.bf16 %v609_v56, %v568_v54  ;;  %v1620_v25 = vpack.c.bf16 %v608_v62, %v567_v21  ;;  %v707_v61 = vmul.f32 %v2590_v48, %v2485_v15  ;;  %v706_v4 = vmul.f32 %v2593_v50, %v2482_v13 }
 0x203   : > { %v1787_v26 = vunpack.i.h.bf16 %v1785_v23  ;;  %v1786_v28 = vunpack.i.l.bf16 %v1785_v23  ;;  %v1782_v29 = vunpack.i.h.bf16 %v1780_v60  ;;  %v1781_v30 = vunpack.i.l.bf16 %v1780_v60 }
 0x204   : > { %1619 = vmatprep.subr.bf16.mxu1 %v1618_v24 }
 0x205   : > { %1621 = vmatpush1.bf16.msra.mxu1 %v1620_v25  ;;  %v650_v32 = vsel %vm648_vm8, %v1781_v30, %v1782_v29  ;;  %v691_v38 = vsel %vm689_vm6, %v1786_v28, %v1787_v26  ;;  %v649_v40 = vsel %vm648_vm8, %v643_v5, %v1781_v30  ;;  %v690_v41 = vsel %vm689_vm6, %v684_v7, %v1786_v28  ;;  %v531_v28 = vld [vmem:[#allocation10] sm:$0xff]  ;;  %v1252_v29 = vld [vmem:[%s2746_s4] sm:$0xff] }
 0x206   : > { %v738_v42 = vpop.permute.xlu1 %737  ;;  %v777_v45 = vpop.permute.xlu0 %776  ;;  %v1622_v46 = vpack.c.bf16 %v691_v38, %v650_v32  ;;  %v1624_v47 = vpack.c.bf16 %v690_v41, %v649_v40 }
 0x208   : > { %1623 = vmatprep.subr.bf16.mxu1 %v1622_v46 }
 0x209   : > { %1625 = vmatpush1.bf16.msra.mxu1 %v1624_v47 }
 0x20a   : > { %v1800_v2 = vpop.permute.xlu1 %1799  ;;  %v1790_v51 = vpop.permute.xlu0 %1789 }
 0x20b   : > { %v1792_v55 = vunpack.i.h.bf16 %v1790_v51  ;;  %v1791_v59 = vunpack.i.l.bf16 %v1790_v51  ;;  %v1802_v5 = vunpack.i.h.bf16 %v1800_v2  ;;  %v1801_v7 = vunpack.i.l.bf16 %v1800_v2 }
 0x20d   : > { %v744_v9 = vsel %vm672_vm1, %v1791_v59, %v1792_v55  ;;  %v743_v27 = vsel %vm672_vm1, %v738_v42, %v1791_v59  ;;  %v822_v13 = vsel %vm590_vm2, %v1801_v7, %v1802_v5 }
 0x20e   : > { %v816_v14 = vpop.permute.xlu1 %815  ;;  %v1795_v22 = vpop.permute.xlu0 %1794  ;;  %v1626_v16 = vpack.c.bf16 %v744_v9, %v707_v61  ;;  %v1628_v17 = vpack.c.bf16 %v743_v27, %v706_v4  ;;  %v1331_v9 = vld [vmem:[#allocation9 + $0x10] sm:$0xff] }
 0x20f   : > { %v1797_v18 = vunpack.i.h.bf16 %v1795_v22  ;;  %v1796_v20 = vunpack.i.l.bf16 %v1795_v22  ;;  %v821_v54 = vsel %vm590_vm2, %v816_v14, %v1801_v7  ;;  %v1334_v22 = vld [vmem:[#allocation9 + $0x28] sm:$0xff] }
 0x210   : > { %1627 = vmatprep.subr.bf16.mxu1 %v1626_v16  ;;  %v1336_v16 = vld [vmem:[#allocation9 + $0x38] sm:$0xff] }
 0x211   : > { %1629 = vmatpush1.bf16.msra.mxu1 %v1628_v17  ;;  %v783_v15 = vsel %vm631_vm4, %v1796_v20, %v1797_v18  ;;  %v782_v56 = vsel %vm631_vm4, %v777_v45, %v1796_v20  ;;  %v1333_v17 = vld [vmem:[#allocation9 + $0x20] sm:$0xff]  ;;  %v1654_v18 = vpack.c.bf16 %v1336_v16, %v1334_v22  ;;  %v1335_v20 = vld [vmem:[#allocation9 + $0x30] sm:$0xff] }
 0x212   : > { %v859_v21 = vpop.permute.xlu1 %858  ;;  %v857_v62 = vpop.permute.xlu0 %856  ;;  %v1630_v23 = vpack.c.bf16 %v822_v13, %v783_v15  ;;  %v1632_v60 = vpack.c.bf16 %v821_v54, %v782_v56  ;;  %v1338_v54 = vld [vmem:[#allocation9 + $0x48] sm:$0xff]  ;;  %v1340_v15 = vld [vmem:[#allocation9 + $0x58] sm:$0xff]  ;;  %v1337_v13 = vld [vmem:[#allocation9 + $0x40] sm:$0xff] }
 0x213   : > { %v861_v24 = vsel %vm549_vm3, %v857_v62, %v859_v21 }
 0x214   : > { %1631 = vmatprep.subr.bf16.mxu1 %v1630_v23  ;;  %v1342_v23 = vld [vmem:[#allocation9 + $0x68] sm:$0xff] }
 0x215   : > { %1633 = vmatpush1.bf16.msra.mxu1 %v1632_v60  ;;  %v1344_v60 = vld [vmem:[#allocation9 + $0x78] sm:$0xff] }
 0x216   : > { %v855_v25 = vpop.permute.xlu0 %854  ;;  %910 = vmatprep.subr.mxu1 %v861_v24  ;;  %v1662_v24 = vpack.c.bf16 %v1344_v60, %v1342_v23 }
 0x217   : > { %v860_v26 = vsel %vm549_vm3, %v855_v25, %v857_v62 }
 0x219   : > { %911 = vmatpush1.msra.mxu1 %v860_v26  ;;  %v1341_v26 = vld [vmem:[#allocation9 + $0x60] sm:$0xff] }
 0x21a   : > { %1583 = vmatmul.mubr.msk.f32.vlgmr.msra.gmra.mrb[0].mxu1 %vm890_vm10, %v531_v28  ;;  %1597 = vmatprep.subr.mxu1 %v2067_v0 }
 0x21b   : > { %1598 = vmatpush3.msk.msra.mxu1 %vm526_vm5, %v2400_v39  ;;  %1599 = vmatprep.mubr.msk.f32.mxu1 %vm2077_vm11, %v2067_v0 }
 0x21e   : > { %1600 = vmatmul.mubr.msk.f32.vlgmr.msra.gmra.mrb[2].mxu1 %vm1253_vm12, %v1252_v29 }
 0x21f   : > { %1416 = vmatprep.mubr.f32.mxu1 %v2067_v0 }
 0x223   : > { %v888_v30 = vpop.permute.xlu1 %887 }
 0x2ed   : > { %v960_v31 = vpop.f32.mrb[0].mxu1 }
 0x2ee   : > { %v961_v32 = vadd.f32 %v960_v31, %v888_v30  ;;  %v962_v38 = vpop.f32.mrb[1].mxu1  ;;  %v2079_v31 = vmov 2  }
 0x2ef   : > { %v963_v40 = vadd.f32 %v962_v38, %v888_v30  ;;  %v2078_v30 = vmov 1   ;;  %1840 = vset.pattern.permute.xlu0 %v2079_v31  ;;  %v1005_v38 = vpop.permute.xlu1 %1004 }
 0x2f0   : > { %vm965_vm13 = vcmp.ge.f32.partialorder %v961_v32, 0.0  ;;  %v967_v41 = vmul.f32 0.2, %v961_v32  ;;  %1839 = vset.pattern.permute.xlu1 %v2078_v30 }
 0x2f1   : > { %vm966_vm14 = vcmp.ge.f32.partialorder %v963_v40, 0.0  ;;  %v968_v39 = vmul.f32 0.2, %v963_v40 }
 0x2f2   : > { %v2616_v42 = vsel %vm965_vm13, %v961_v32, %v967_v41  ;;  %v984_v32 = vpop.permute.xlu0 %983 }
 0x2f3   : > { %v2618_v45 = vsel %vm966_vm14, %v963_v40, %v968_v39  ;;  %v999_v46 = vmul.f32 %v2616_v42, %v2471_v10  ;;  %v978_v47 = vmul.f32 %v2616_v42, %v2475_v11  ;;  %v1041_v0 = vmul.f32 %v2616_v42, %v2467_v8  ;;  %v1332_v8 = vld [vmem:[#allocation9 + $0x18] sm:$0xff]  ;;  %v1047_v40 = vpop.permute.xlu1 %1046 }
 0x2f4   : > { %v1000_v2 = vmul.f32 %v2618_v45, %v2452_v63  ;;  %v979_v51 = vmul.f32 %v2618_v45, %v2442_v57  ;;  %v1042_v55 = vmul.f32 %v2618_v45, %v2458_v3  ;;  %v1020_v59 = vmul.f32 %v2616_v42, %v2479_v12  ;;  %v1330_v63 = vld [vmem:[#allocation9 + $0x8] sm:$0xff]  ;;  %v1329_v57 = vld [vmem:[#allocation9] sm:$0xff] }
 0x2f5   : > { %v1021_v10 = vmul.f32 %v2618_v45, %v2456_v1  ;;  %v1650_v7 = vpack.c.bf16 %v1332_v8, %v1330_v63  ;;  %v1652_v3 = vpack.c.bf16 %v1331_v9, %v1329_v57  ;;  %v1067_v1 = vmul.f32 %v2616_v42, %v2463_v6 }
 0x2f6   : > { %v1809_v61 = vpack.i.bf16 %v1000_v2, %v999_v46  ;;  %v1804_v11 = vpack.i.bf16 %v979_v51, %v978_v47  ;;  %v1819_v4 = vpack.i.bf16 %v1042_v55, %v1041_v0  ;;  %v1088_v12 = vmul.f32 %v2616_v42, %v2491_v19 }
 0x2f7   : > { %v1814_v5 = vpack.i.bf16 %v1021_v10, %v1020_v59  ;;  %1651 = vmatprep.subr.bf16.mxu1 %v1650_v7  ;;  %v1110_v27 = vmul.f32 %v2618_v45, %v2515_v35  ;;  %v1068_v14 = vmul.f32 %v2618_v45, %v2511_v34  ;;  %v1656_v6 = vpack.c.bf16 %v1335_v20, %v1333_v17  ;;  %v1339_v35 = vld [vmem:[#allocation9 + $0x50] sm:$0xff] }
 0x2f8   : > { %1810 = vrot.lane.b32.xlu1 %v1809_v61, %s2074_s18  ;;  %1805 = vrot.lane.b32.xlu0 %v1804_v11, %s2075_s17  ;;  %v1658_v19 = vpack.c.bf16 %v1340_v15, %v1338_v54  ;;  %v1089_v21 = vmul.f32 %v2618_v45, %v2533_v43  ;;  %v1660_v62 = vpack.c.bf16 %v1339_v35, %v1337_v13  ;;  %v1325_v43 = vpop.f32.mrb[2].mxu1  ;;  %s2773_s18 = sld [smem:[#allocation19_spill]] }
 0x2f9   : > { %1653 = vmatpush1.bf16.msra.mxu1 %v1652_v3  ;;  %v1834_v56 = vpack.i.bf16 %v2521_v37, %v1110_v27  ;;  %v1824_v34 = vpack.i.bf16 %v2519_v36, %v1068_v14  ;;  %v1109_v25 = vmul.f32 %v2616_v42, %v2507_v33  ;;  %v1343_v37 = vld [vmem:[#allocation9 + $0x70] sm:$0xff]  ;;  %v1601_v29 = vpop.f32.mrb[3].mxu1  ;;  %v1131_v33 = vmul.f32 %v2618_v45, %v2552_v52  ;;  %v1026_v52 = vpop.permute.xlu0 %1025 }
 0x2fa   : > { %1655 = vmatprep.subr.bf16.mxu1 %v1654_v18  ;;  %v1829_v36 = vpack.i.bf16 %v2537_v44, %v1089_v21  ;;  %v1664_v28 = vpack.c.bf16 %v1343_v37, %v1341_v26  ;;  %v1130_v44 = vmul.f32 %v2616_v42, %v2543_v49  ;;  %v1060_v18 = vmul.f32 %v2616_v42, %v2593_v50 }
 0x2fb   : > { %v1061_v20 = vmul.f32 %v2618_v45, %v2590_v48 }
 0x2fc   : > { %1820 = vrot.lane.b32.xlu1 %v1819_v4, %s2072_s29  ;;  %1815 = vrot.lane.b32.xlu0 %v1814_v5, %s2073_s13 }
 0x2fd   : > { %1657 = vmatpush1.bf16.msra.mxu1 %v1656_v6 }
 0x2fe   : > { %1659 = vmatprep.subr.bf16.mxu1 %v1658_v19 }
 0x300   : > { %1073 = vrot.lane.b32.xlu1 %v1067_v1, %s2071_s20  ;;  %1094 = vrot.lane.b32.xlu0 %v1088_v12, %s2070_s25 }
 0x301   : > { %1661 = vmatpush1.bf16.msra.mxu1 %v1660_v62 }
 0x302   : > { %1663 = vmatprep.subr.bf16.mxu1 %v1662_v24 }
 0x304   : > { %1835 = vrot.lane.b32.xlu1 %v1834_v56, %s2068_s14  ;;  %1825 = vrot.lane.b32.xlu0 %v1824_v34, %s2071_s20 }
 0x305   : > { %1665 = vmatpush1.bf16.msra.mxu1 %v1664_v28  ;;  %v973_v28 = vld [vmem:[#allocation12] sm:$0xff] }
 0x308   : > { %1115 = vrot.lane.b32.xlu1 %v1109_v25, %s2068_s14  ;;  %1830 = vrot.lane.b32.xlu0 %v1829_v36, %s2070_s25  ;;  %s1577_s14 = sshll.u32 %s2353_s2, 4 }
 0x309   : > { %1587 = vmatmul.mubr.msk.f32.vlgmr.msra.gmra.mrb[4].mxu1 %vm443_vm0, %v1325_v43  ;;  %s416_s25 = scalar_lea.vmem [#allocation13], %s1577_s14 }
 0x30a   : > { %s1442_s20 = sshll.u32 %s416_s25, 4  ;;  %s2700_s20 = int_to_ptr.vmem [resolvable:$true] %s1442_s20 }
 0x30b   : > { %p1991_p3 = scmp.lt.s32.totalorder %s2700_s20, %s1989_s24 }
 0x30c   : > { %1140 = vrot.lane.b32.xlu1 %v2554_v53, %s2069_s9  ;;  %1138 = vrot.lane.b32.xlu0 %v1131_v33, %s2069_s9 }
 0x310   : > { %1136 = vrot.lane.b32.xlu0 %v1130_v44, %s2069_s9  ;;  %1169 = vperm.xlu1 %1839, %v2566_v58   ;;  %s1594_s9 = sshll.u32 %s2152_s15, 8  ;;  %s1984_s15 = scalar_lea.vmem %s2700_s20, 256 }
 0x311   : > { %s2698_s17 = scalar_lea.hbm %s2773_s18, %s1594_s9  ;;  %p1985_p5 = scmp.ne.s32.totalorder %s2700_s20, %s1984_s15 }
 0x312   : > { %p1992_p13 = scmp.lt.s32.totalorder %s1990_s21, %s1984_s15 }
 0x313   : > { %p1986_p9 = pnand %p1985_p5, %p2774_p7 }
 0x314   : > { %1346 = vperm.xlu0 %1840, %v2566_v58   ;;  %p1993_p0 = por %p1992_p13, %p1991_p3 }
 0x315   : > { %p1987_p12 = pneg %p1986_p9 }
 0x317   : > { %p1994_p2 = pnand %p1993_p0, %p1987_p12 }
 0x36a   : > { %v1811_v41 = vpop.permute.xlu1 %1810  ;;  %v1806_v39 = vpop.permute.xlu0 %1805 }
 0x36b   : > { %v1813_v53 = vunpack.i.h.bf16 %v1811_v41  ;;  %v1812_v46 = vunpack.i.l.bf16 %v1811_v41  ;;  %v1808_v47 = vunpack.i.h.bf16 %v1806_v39  ;;  %v1807_v0 = vunpack.i.l.bf16 %v1806_v39 }
 0x36d   : > { %v1010_v2 = vsel %vm607_vm7, %v1005_v38, %v1812_v46  ;;  %v989_v49 = vsel %vm566_vm9, %v984_v32, %v1807_v0  ;;  %v990_v51 = vsel %vm566_vm9, %v1807_v0, %v1808_v47  ;;  %v1011_v55 = vsel %vm607_vm7, %v1812_v46, %v1813_v53 }
 0x36e   : > { %v1636_v59 = vpack.c.bf16 %v1010_v2, %v989_v49  ;;  %v1821_v58 = vpop.permute.xlu1 %1820  ;;  %v1816_v10 = vpop.permute.xlu0 %1815  ;;  %v1634_v61 = vpack.c.bf16 %v1011_v55, %v990_v51 }
 0x36f   : > { %v1823_v11 = vunpack.i.h.bf16 %v1821_v58  ;;  %v1822_v4 = vunpack.i.l.bf16 %v1821_v58  ;;  %v1818_v5 = vunpack.i.h.bf16 %v1816_v10  ;;  %v1817_v63 = vunpack.i.l.bf16 %v1816_v10 }
 0x370   : > { %1635 = vmatprep.subr.bf16.mxu0 %v1634_v61 }
 0x371   : > { %v1052_v8 = vsel %vm689_vm6, %v1047_v40, %v1822_v4  ;;  %v1031_v57 = vsel %vm648_vm8, %v1026_v52, %v1817_v63  ;;  %1637 = vmatpush1.bf16.msra.mxu0 %v1636_v59  ;;  %v1032_v7 = vsel %vm648_vm8, %v1817_v63, %v1818_v5  ;;  %v1053_v9 = vsel %vm689_vm6, %v1822_v4, %v1823_v11 }
 0x372   : > { %v1640_v3 = vpack.c.bf16 %v1052_v8, %v1031_v57  ;;  %v1074_v1 = vpop.permute.xlu1 %1073  ;;  %v1095_v12 = vpop.permute.xlu0 %1094  ;;  %v1638_v27 = vpack.c.bf16 %v1053_v9, %v1032_v7 }
 0x374   : > { %1639 = vmatprep.subr.bf16.mxu0 %v1638_v27 }
 0x375   : > { %1641 = vmatpush1.bf16.msra.mxu0 %v1640_v3 }
 0x376   : > { %v1836_v14 = vpop.permute.xlu1 %1835  ;;  %v1826_v22 = vpop.permute.xlu0 %1825 }
 0x377   : > { %v1828_v16 = vunpack.i.h.bf16 %v1826_v22  ;;  %v1827_v17 = vunpack.i.l.bf16 %v1826_v22  ;;  %v1838_v6 = vunpack.i.h.bf16 %v1836_v14  ;;  %v1837_v54 = vunpack.i.l.bf16 %v1836_v14 }
 0x379   : > { %v1079_v15 = vsel %vm672_vm1, %v1074_v1, %v1827_v17  ;;  %v1080_v19 = vsel %vm672_vm1, %v1827_v17, %v1828_v16  ;;  %v1122_v42 = vsel %vm590_vm2, %v1837_v54, %v1838_v6 }
 0x37a   : > { %v1644_v13 = vpack.c.bf16 %v1079_v15, %v1060_v18  ;;  %v1116_v35 = vpop.permute.xlu1 %1115  ;;  %v1831_v56 = vpop.permute.xlu0 %1830  ;;  %v1642_v34 = vpack.c.bf16 %v1080_v19, %v1061_v20 }
 0x37b   : > { %v1833_v21 = vunpack.i.h.bf16 %v1831_v56  ;;  %v1832_v62 = vunpack.i.l.bf16 %v1831_v56  ;;  %v1121_v23 = vsel %vm590_vm2, %v1116_v35, %v1837_v54 }
 0x37c   : > { %1643 = vmatprep.subr.bf16.mxu0 %v1642_v34 }
 0x37d   : > { %v1100_v50 = vsel %vm631_vm4, %v1095_v12, %v1832_v62  ;;  %1645 = vmatpush1.bf16.msra.mxu0 %v1644_v13  ;;  %v1101_v48 = vsel %vm631_vm4, %v1832_v62, %v1833_v21 }
 0x37e   : > { %v1648_v45 = vpack.c.bf16 %v1121_v23, %v1100_v50  ;;  %v1141_v60 = vpop.permute.xlu1 %1140  ;;  %v1139_v24 = vpop.permute.xlu0 %1138  ;;  %v1646_v25 = vpack.c.bf16 %v1122_v42, %v1101_v48 }
 0x37f   : > { %v1143_v26 = vsel %vm549_vm3, %v1139_v24, %v1141_v60 }
 0x380   : > { %1647 = vmatprep.subr.bf16.mxu0 %v1646_v25 }
 0x381   : > { %1649 = vmatpush1.bf16.msra.mxu0 %v1648_v45 }
 0x382   : > { %v1137_v37 = vpop.permute.xlu0 %1136  ;;  %1191 = vmatprep.subr.mxu0 %v1143_v26 }
 0x383   : > { %v1142_v36 = vsel %vm549_vm3, %v1137_v37, %v1139_v24 }
 0x385   : > { %1192 = vmatpush1.msra.mxu0 %v1142_v36 }
 0x386   : > { %1584 = vmatmul.mubr.msk.f32.vlgmr.msra.gmra.mrb[2].mxu0 %vm890_vm10, %v973_v28 }
 0x38f   : > { %v1170_v30 = vpop.permute.xlu1 %1169 }
 0x393   : > { %v1347_v31 = vpop.permute.xlu0 %1346 }
 0x3dc   : > { %v1418_v43 = vpop.f32.mrb[4].mxu1 }
 0x3dd   : > { %v1420_v29 = vpop.f32.mrb[5].mxu1  ;;  %v1419_v52 = vadd.f32 %v1418_v43, %v1347_v31 }
 0x3de   : > { %v1421_v41 = vadd.f32 %v1420_v29, %v1347_v31 }
 0x459   : > { %v1241_v33 = vpop.f32.mrb[2].mxu0 }
 0x45a   : > { %v1242_v44 = vadd.f32 %v1241_v33, %v1170_v30  ;;  %v1243_v32 = vpop.f32.mrb[3].mxu0 }
 0x45b   : > { %v1244_v38 = vadd.f32 %v1243_v32, %v1170_v30 }
 0x45c   : > { %vm1246_vm15 = vcmp.ge.f32.partialorder %v1242_v44, 0.0  ;;  %v1248_v40 = vmul.f32 0.2, %v1242_v44 }
 0x45d   : > { %vm1247_vm0 = vcmp.ge.f32.partialorder %v1244_v38, 0.0  ;;  %v1249_v39 = vmul.f32 0.2, %v1244_v38 }
 0x45e   : > { %v1250_v53 = vsel %vm1246_vm15, %v1242_v44, %v1248_v40 }
 0x45f   : > { %v1251_v46 = vsel %vm1247_vm0, %v1244_v38, %v1249_v39  ;;  %v1423_v47 = vadd.f32 %v1419_v52, %v1250_v53 }
 0x460   : > { %v1424_v0 = vadd.f32 %v1421_v41, %v1251_v46 }
 0x461   : > { %1425 = vst [vmem:[%s416_s25] sm:$0xff] %v1423_v47 }
 0x462   : > { %1426 = vst [vmem:[%s416_s25 + $0x8] sm:$0xff] %v1424_v0 }
 0x463   : > { %1997 = shalt.err (!%p1994_p2)
}
 0x464   : > { %s1998_s2 = scalar_lea.hbm %s2698_s17, 256  ;;  %s2002_s9 = scalar_lea.hbm %s2773_s18, 512 }
 0x465   : > { %p1999_p8 = scmp.ne.s32.totalorder %s2698_s17, %s1998_s2  ;;  %p2003_p11 = scmp.lt.u32.totalorder %s2698_s17, %s2773_s18 }
 0x466   : > { %p2004_p1 = scmp.lt.u32.totalorder %s2002_s9, %s1998_s2  ;;  %p2006_p5 = scmp.lt.u32.totalorder %s1998_s2, %s2698_s17 }
 0x467   : > { %p2000_p4 = pnand %p1999_p8, %p2774_p7 }
 0x468   : > { %p2005_p6 = por %p2004_p1, %p2003_p11 }
 0x469   : > { %p2001_p10 = pneg %p2000_p4 }
 0x46a   : > { %p2007_p9 = por %p2006_p5, %p2005_p6 }
 0x46c   : > { %p2008_p12 = pnand %p2007_p9, %p2001_p10 }
 0x46e   : > { %2011 = shalt.err (!%p2008_p12)
}
 0x46f   : > { %1684 = dma.vmem_to_hbm [thread:$0]  (%p2774_p7), %s2700_s20, 256, %s2698_s17, %s1428_s23  }
 0x470 PF: > { %s1454_s13 = sand.u32 1, %s2046_s30   ;;  %p2775_p3 = scmp.ne.s32.totalorder %s2766_s28, 0 }
 0x471   : > { %p2776_p13 = scmp.ge.s32.totalorder %s2058_s12, 2  ;;  %s1455_s15 = scalar_lea.sflag [#allocation6], %s1454_s13 }
 0x473   : > { %p1704_p0 = pnand %p2776_p13, %p2775_p3 }
 0x475   : > { %2041 = dma.done.wait (!%p1704_p0), %s1455_s15, 256  }
 0x476   : > { %2043 = vsyncadd (!%p1704_p0), %s1455_s15, 4294967040  ;;  %p24_p2 = scmp.ge.s32.totalorder %s2277_s19, 4   ;;  %s2777_s30 = smov %s2050_s10 }
 0x477   : > { %s2778_s10 = smov %s2054_s11  ;;  %s2779_s11 = smov %s2288_s22 }
 0x478   : > { %s2780_s12 = smov %s2277_s19  ;;  %26 = sbr.rel (!%p24_p2) target bundleno = 10 (0xa), region = 120 }
 0x47f   :  { %1460 = vsyncpa [#allocation5], 1 }
 0x480   :  { %1462 = vsyncpa [#allocation5 + $0x1], 1 }
 0x481   :  { %1463 = vsyncpa [#allocation8], 1 }
 0x482   :  { %1464 = vsyncpa [#allocation11], 1 }
 0x483   :  { %1465 = vsyncpa [#allocation6], 1 }
 0x484   :  { %1467 = vsyncpa [#allocation6 + $0x1], 1 }

</bundles_post_ra>
